<compile_context>
chip_gen: v7x
topology: tpu7x:2x2x1
jax: 0.10.0
libtpu: 0.0.40
codegen_flags: <defaults>
</compile_context>

<pallas_src>
import jax
import jax.numpy as jnp
from jax.experimental import pallas as pl
from jax.experimental.pallas import tpu as pltpu

# ---------------- tiny synthetic BERT config ----------------
VOCAB = 100
TYPE_VOCAB = 2
MAX_POS = 32
HIDDEN = 32
N_HEADS = 2
HEAD_DIM = HIDDEN // N_HEADS
INTERMEDIATE = 64
N_LAYERS = 2
N_TENSE = 4        # tense_classifier: Linear(hidden*3, 4)
N_POLARITY = 3     # polarity_classifier: Linear(hidden*3, 3)
N_CLS = N_POLARITY + N_TENSE
LN_EPS = 1e-12
ATTN_MASK_PENALTY = -10000.0       # HF-BERT extended attention mask value
POOL_MASK_PENALTY = -10000000.0    # matches the PyTorch module exactly


# ---------------- in-kernel helpers ----------------
def _softmax(x):
    m = jnp.max(x, axis=-1, keepdims=True)
    e = jnp.exp(x - m)
    return e * pl.reciprocal(jnp.sum(e, axis=-1, keepdims=True), approx=True)


def _ln(x, g, b):
    mean = jnp.mean(x, axis=-1, keepdims=True)
    var = jnp.mean((x - mean) * (x - mean), axis=-1, keepdims=True)
    inv = jax.lax.rsqrt(var + LN_EPS)
    return (x - mean) * inv * g + b


def _gelu(y):
    # TODO(synk): HF BERT default is exact erf GELU; tanh approximation used
    # here (tiny numerical difference, guaranteed Mosaic lowering).
    return 0.5 * y * (1.0 + jnp.tanh(0.7978845608028654 * (y + 0.044715 * y * y * y)))


# ---------------- fused encoder kernel (one call for all layers) ----------------
def _encoder_kernel(emb_ref, mask_ref, eg_ref, eb_ref,
                    wqkv_ref, bqkv_ref, wo_ref, bo_ref,
                    ln1g_ref, ln1b_ref, w1_ref, b1_ref,
                    w2_ref, b2_ref, ln2g_ref, ln2b_ref, o_ref):
    x = emb_ref[0]                               # (S, H) — one batch element
    addm = mask_ref[0]                           # (1, S) additive attention mask
    h = _ln(x, eg_ref[...], eb_ref[...])         # embedding LayerNorm
    S = h.shape[0]
    scale = 1.0 / (HEAD_DIM ** 0.5)

    for l in range(N_LAYERS):                    # static unroll (N_LAYERS small)
        # fused QKV projection: (S, 3H)
        qkv = jnp.dot(h, wqkv_ref[l], preferred_element_type=jnp.float32) + bqkv_ref[l]
        wo_l = wo_ref[l]                         # (H, H)

        # per-head attention, output projection folded in (no lane concat)
        attn = jnp.zeros((S, HIDDEN), jnp.float32)
        for hd in range(N_HEADS):
            lo = hd * HEAD_DIM
            q_h = qkv[:, lo:lo + HEAD_DIM]
            k_h = qkv[:, HIDDEN + lo:HIDDEN + lo + HEAD_DIM]
            v_h = qkv[:, 2 * HIDDEN + lo:2 * HIDDEN + lo + HEAD_DIM]
            s = jnp.dot(q_h, k_h.T, preferred_element_type=jnp.float32) * scale + addm
            p = _softmax(s)
            ctx = jnp.dot(p, v_h, preferred_element_type=jnp.float32)
            attn = attn + jnp.dot(ctx, wo_l[lo:lo + HEAD_DIM, :],
                                  preferred_element_type=jnp.float32)
        attn = attn + bo_ref[l]

        # residual + LN1 (fused)
        h1 = _ln(attn + h, ln1g_ref[l], ln1b_ref[l])

        # FFN
        ffn = jnp.dot(h1, w1_ref[l], preferred_element_type=jnp.float32) + b1_ref[l]
        ffn = _gelu(ffn)
        ffn = jnp.dot(ffn, w2_ref[l], preferred_element_type=jnp.float32) + b2_ref[l]

        # residual + LN2 (fused)
        h = _ln(ffn + h1, ln2g_ref[l], ln2b_ref[l])

    o_ref[0] = h


def bert_encoder(params, emb, addmask):
    """emb: (B, S, H) summed embeddings; addmask: (B, 1, S) additive mask."""
    B, S, H = emb.shape
    L, I = N_LAYERS, INTERMEDIATE

    def full(shape):
        return pl.BlockSpec(shape, lambda b, _s=shape: (0,) * len(_s))

    return pl.pallas_call(
        _encoder_kernel,
        out_shape=jax.ShapeDtypeStruct((B, S, H), jnp.float32),
        grid=(B,),
        in_specs=[
            pl.BlockSpec((1, S, H), lambda b: (b, 0, 0)),   # embeddings
            pl.BlockSpec((1, 1, S), lambda b: (b, 0, 0)),   # additive attn mask
            full((1, H)), full((1, H)),                     # embedding LN
            full((L, H, 3 * H)), full((L, 1, 3 * H)),       # fused QKV
            full((L, H, H)), full((L, 1, H)),               # output projection
            full((L, 1, H)), full((L, 1, H)),               # LN1
            full((L, H, I)), full((L, 1, I)),               # FFN1
            full((L, I, H)), full((L, 1, H)),               # FFN2
            full((L, 1, H)), full((L, 1, H)),               # LN2
        ],
        out_specs=pl.BlockSpec((1, S, H), lambda b: (b, 0, 0)),
        compiler_params=pltpu.CompilerParams(
            dimension_semantics=("parallel",)),             # 2 TCs on v7x
    )(emb, addmask,
      params["emb_ln_g"].reshape(1, H), params["emb_ln_b"].reshape(1, H),
      params["wqkv"], params["bqkv"], params["wo"], params["bo"],
      params["ln1_g"], params["ln1_b"], params["w1"], params["b1"],
      params["w2"], params["b2"], params["ln2_g"], params["ln2_b"])


# ---------------- fused head kernel (pool + twin classifiers + softmax) ----------
def _head_kernel(seq_ref, padd_ref, trig_ref, w_ref, b_ref, pol_ref, ten_ref):
    x = seq_ref[...]                                  # (B, S, H)
    # masked max-pool over the sequence axis (== transpose + AdaptiveMaxPool1d(1))
    masked = x + padd_ref[...][:, :, None]            # additive pool penalty
    pooled = jnp.max(masked, axis=1)                  # (B, H)
    w = w_ref[...]                                    # (3H, 7) fused [pol|tense]
    # avoid lane-axis concat: split the fused weight by rows instead
    logits = (jnp.dot(pooled, w[:HIDDEN, :], preferred_element_type=jnp.float32)
              + jnp.dot(trig_ref[...], w[HIDDEN:, :], preferred_element_type=jnp.float32)
              + b_ref[...])                           # (B, 7)
    pol_ref[...] = _softmax(logits[:, :N_POLARITY])
    ten_ref[...] = _softmax(logits[:, N_POLARITY:])


def attribution_head(seq_out, pool_add, trigger_feature, w_head, b_head):
    B, S, H = seq_out.shape
    F = trigger_feature.shape[1]          # 2*H
    D = H + F                             # 3*H
    return pl.pallas_call(
        _head_kernel,
        out_shape=(
            jax.ShapeDtypeStruct((B, N_POLARITY), jnp.float32),
            jax.ShapeDtypeStruct((B, N_TENSE), jnp.float32),
        ),
        grid=(1,),
        in_specs=[
            pl.BlockSpec((B, S, H), lambda i: (0, 0, 0)),
            pl.BlockSpec((B, S), lambda i: (0, 0)),
            pl.BlockSpec((B, F), lambda i: (0, 0)),
            pl.BlockSpec((D, N_CLS), lambda i: (0, 0)),
            pl.BlockSpec((1, N_CLS), lambda i: (0, 0)),
        ],
        out_specs=(
            pl.BlockSpec((B, N_POLARITY), lambda i: (0, 0)),
            pl.BlockSpec((B, N_TENSE), lambda i: (0, 0)),
        ),
    )(seq_out, pool_add, trigger_feature, w_head, b_head)


# ---------------- parameter init (deterministic, synthetic) ----------------
def init_params(key):
    def nrm(k, shape):
        return 0.02 * jax.random.normal(k, shape, jnp.float32)

    keys = iter(jax.random.split(key, 32))
    H, I, L = HIDDEN, INTERMEDIATE, N_LAYERS
    return {
        "word_emb": nrm(next(keys), (VOCAB, H)),
        "pos_emb": nrm(next(keys), (MAX_POS, H)),
        "type_emb": nrm(next(keys), (TYPE_VOCAB, H)),
        "emb_ln_g": jnp.ones((H,), jnp.float32),
        "emb_ln_b": jnp.zeros((H,), jnp.float32),
        # per-layer weights stacked along a leading layer axis
        "wqkv": nrm(next(keys), (L, H, 3 * H)),                 # [Wq | Wk | Wv]
        "bqkv": jnp.zeros((L, 1, 3 * H), jnp.float32),
        "wo": nrm(next(keys), (L, H, H)),
        "bo": jnp.zeros((L, 1, H), jnp.float32),
        "ln1_g": jnp.ones((L, 1, H), jnp.float32),
        "ln1_b": jnp.zeros((L, 1, H), jnp.float32),
        "w1": nrm(next(keys), (L, H, I)),
        "b1": jnp.zeros((L, 1, I), jnp.float32),
        "w2": nrm(next(keys), (L, I, H)),
        "b2": jnp.zeros((L, 1, H), jnp.float32),
        "ln2_g": jnp.ones((L, 1, H), jnp.float32),
        "ln2_b": jnp.zeros((L, 1, H), jnp.float32),
        # classifier heads fused: columns = [polarity(3) | tense(4)], biases zero
        "w_head": nrm(next(keys), (3 * H, N_CLS)),
        "b_head": jnp.zeros((1, N_CLS), jnp.float32),
    }


# ---------------- forward (mirrors BertAttributionModel.forward, labels=None) ----
def bert_attribution_forward(params, token_ids, attention_masks, token_type_ids,
                             trigger_index, pooling_masks):
    B, S = token_ids.shape
    # embedding gathers (plain JAX)
    emb = (params["word_emb"][token_ids]
           + params["pos_emb"][:S][None, :, :]
           + params["type_emb"][token_type_ids])
    # head-invariant additive attention mask, computed once per batch
    addmask = ((1.0 - attention_masks.astype(jnp.float32))
               * ATTN_MASK_PENALTY).reshape(B, 1, S)

    seq_out = bert_encoder(params, emb, addmask)                 # (B, S, H)

    # trigger batch-gather (== torch.gather along dim 1), then flatten
    trig = jnp.take_along_axis(seq_out, trigger_index[:, :, None], axis=1).reshape(B, -1)

    pool_add = (1.0 - pooling_masks.astype(jnp.float32)) * POOL_MASK_PENALTY
    # dropout_layer is identity in eval mode
    polarity_probs, tense_probs = attribution_head(
        seq_out, pool_add, trig, params["w_head"], params["b_head"])
    return polarity_probs, tense_probs
    # TODO(synk): labels path (CrossEntropyLoss) not implemented; matches labels=None.


if __name__ == "__main__":
    B, S = 2, 8
    key = jax.random.PRNGKey(0)
    kp, k1, k2, k3 = jax.random.split(key, 4)
    params = init_params(kp)

    token_ids = jax.random.randint(k1, (B, S), 0, VOCAB, dtype=jnp.int32)
    attention_masks = jnp.ones((B, S), jnp.float32).at[:, S - 2:].set(0.0)
    token_type_ids = jnp.zeros((B, S), jnp.int32)
    trigger_index = jax.random.randint(k2, (B, 2), 0, S, dtype=jnp.int32)  # n=2 -> hidden*3 classifier input
    pooling_masks = jnp.ones((B, S), jnp.float32).at[:, S - 2:].set(0.0)

    fwd = jax.jit(bert_attribution_forward)
    polarity_probs, tense_probs = fwd(
        params, token_ids, attention_masks, token_type_ids, trigger_index, pooling_masks)
    jax.block_until_ready((polarity_probs, tense_probs))

    assert polarity_probs.shape == (B, N_POLARITY)
    assert tense_probs.shape == (B, N_TENSE)
    assert bool(jnp.all(jnp.isfinite(polarity_probs))) and bool(jnp.all(jnp.isfinite(tense_probs)))
    print("KERNEL_OK")
</pallas_src>

<mosaic_0001>
module attributes {stable_mosaic.version = 11 : i64} {
  func.func @_encoder_kernel(%arg0: i32, %arg1: memref<1x8x32xf32, #tpu.memory_space<vmem>>, %arg2: memref<1x1x8xf32, #tpu.memory_space<vmem>>, %arg3: memref<1x32xf32, #tpu.memory_space<vmem>>, %arg4: memref<1x32xf32, #tpu.memory_space<vmem>>, %arg5: memref<2x32x96xf32, #tpu.memory_space<vmem>>, %arg6: memref<2x1x96xf32, #tpu.memory_space<vmem>>, %arg7: memref<2x32x32xf32, #tpu.memory_space<vmem>>, %arg8: memref<2x1x32xf32, #tpu.memory_space<vmem>>, %arg9: memref<2x1x32xf32, #tpu.memory_space<vmem>>, %arg10: memref<2x1x32xf32, #tpu.memory_space<vmem>>, %arg11: memref<2x32x64xf32, #tpu.memory_space<vmem>>, %arg12: memref<2x1x64xf32, #tpu.memory_space<vmem>>, %arg13: memref<2x64x32xf32, #tpu.memory_space<vmem>>, %arg14: memref<2x1x32xf32, #tpu.memory_space<vmem>>, %arg15: memref<2x1x32xf32, #tpu.memory_space<vmem>>, %arg16: memref<2x1x32xf32, #tpu.memory_space<vmem>>, %arg17: memref<1x8x32xf32, #tpu.memory_space<vmem>>) attributes {dimension_semantics = [#tpu.dimension_semantics<parallel>], iteration_bounds = array<i64: 2>, scalar_prefetch = 0 : i64, scratch_operands = 0 : i64, tpu.core_type = #tpu.core_type<tc>, window_params = [{transform_indices = @transform_0, window_bounds = array<i64: 1, 8, 32>}, {transform_indices = @transform_1, window_bounds = array<i64: 1, 1, 8>}, {pipeline_mode = #tpu.pipeline_mode<synchronous>, transform_indices = @transform_2, window_bounds = array<i64: 1, 32>}, {pipeline_mode = #tpu.pipeline_mode<synchronous>, transform_indices = @transform_3, window_bounds = array<i64: 1, 32>}, {pipeline_mode = #tpu.pipeline_mode<synchronous>, transform_indices = @transform_4, window_bounds = array<i64: 2, 32, 96>}, {pipeline_mode = #tpu.pipeline_mode<synchronous>, transform_indices = @transform_5, window_bounds = array<i64: 2, 1, 96>}, {pipeline_mode = #tpu.pipeline_mode<synchronous>, transform_indices = @transform_6, window_bounds = array<i64: 2, 32, 32>}, {pipeline_mode = #tpu.pipeline_mode<synchronous>, transform_indices = @transform_7, window_bounds = array<i64: 2, 1, 32>}, {pipeline_mode = #tpu.pipeline_mode<synchronous>, transform_indices = @transform_8, window_bounds = array<i64: 2, 1, 32>}, {pipeline_mode = #tpu.pipeline_mode<synchronous>, transform_indices = @transform_9, window_bounds = array<i64: 2, 1, 32>}, {pipeline_mode = #tpu.pipeline_mode<synchronous>, transform_indices = @transform_10, window_bounds = array<i64: 2, 32, 64>}, {pipeline_mode = #tpu.pipeline_mode<synchronous>, transform_indices = @transform_11, window_bounds = array<i64: 2, 1, 64>}, {pipeline_mode = #tpu.pipeline_mode<synchronous>, transform_indices = @transform_12, window_bounds = array<i64: 2, 64, 32>}, {pipeline_mode = #tpu.pipeline_mode<synchronous>, transform_indices = @transform_13, window_bounds = array<i64: 2, 1, 32>}, {pipeline_mode = #tpu.pipeline_mode<synchronous>, transform_indices = @transform_14, window_bounds = array<i64: 2, 1, 32>}, {pipeline_mode = #tpu.pipeline_mode<synchronous>, transform_indices = @transform_15, window_bounds = array<i64: 2, 1, 32>}, {transform_indices = @transform_16, window_bounds = array<i64: 1, 8, 32>}]} {
    %c0 = arith.constant 0 : index
    %c0_0 = arith.constant 0 : index
    %c0_1 = arith.constant 0 : index
    %0 = vector.load %arg1[%c0, %c0_0, %c0_1] : memref<1x8x32xf32, #tpu.memory_space<vmem>>, vector<1x8x32xf32>
    %1 = vector.shape_cast %0 : vector<1x8x32xf32> to vector<8x32xf32>
    %c0_2 = arith.constant 0 : index
    %c0_3 = arith.constant 0 : index
    %c0_4 = arith.constant 0 : index
    %2 = vector.load %arg2[%c0_2, %c0_3, %c0_4] : memref<1x1x8xf32, #tpu.memory_space<vmem>>, vector<1x1x8xf32>
    %3 = vector.shape_cast %2 : vector<1x1x8xf32> to vector<1x8xf32>
    %c0_5 = arith.constant 0 : index
    %c0_6 = arith.constant 0 : index
    %4 = vector.load %arg3[%c0_5, %c0_6] : memref<1x32xf32, #tpu.memory_space<vmem>>, vector<1x32xf32>
    %c0_7 = arith.constant 0 : index
    %c0_8 = arith.constant 0 : index
    %5 = vector.load %arg4[%c0_7, %c0_8] : memref<1x32xf32, #tpu.memory_space<vmem>>, vector<1x32xf32>
    %cst = arith.constant dense<0.000000e+00> : vector<8xf32>
    %6 = vector.multi_reduction <add>, %1, %cst [1] : vector<8x32xf32> to vector<8xf32>
    %7 = vector.shape_cast %6 : vector<8xf32> to vector<8x1xf32>
    %cst_9 = arith.constant 3.200000e+01 : f32
    %8 = vector.broadcast %cst_9 : f32 to vector<8x1xf32>
    %9 = arith.divf %7, %8 : vector<8x1xf32>
    %10 = vector.broadcast %9 : vector<8x1xf32> to vector<8x32xf32>
    %11 = arith.subf %1, %10 : vector<8x32xf32>
    %12 = vector.broadcast %9 : vector<8x1xf32> to vector<8x32xf32>
    %13 = arith.subf %1, %12 : vector<8x32xf32>
    %14 = arith.mulf %11, %13 : vector<8x32xf32>
    %cst_10 = arith.constant dense<0.000000e+00> : vector<8xf32>
    %15 = vector.multi_reduction <add>, %14, %cst_10 [1] : vector<8x32xf32> to vector<8xf32>
    %16 = vector.shape_cast %15 : vector<8xf32> to vector<8x1xf32>
    %cst_11 = arith.constant 3.200000e+01 : f32
    %17 = vector.broadcast %cst_11 : f32 to vector<8x1xf32>
    %18 = arith.divf %16, %17 : vector<8x1xf32>
    %cst_12 = arith.constant 9.99999996E-13 : f32
    %19 = vector.broadcast %cst_12 : f32 to vector<8x1xf32>
    %20 = arith.addf %18, %19 : vector<8x1xf32>
    %21 = math.rsqrt %20 : vector<8x1xf32>
    %22 = vector.broadcast %9 : vector<8x1xf32> to vector<8x32xf32>
    %23 = arith.subf %1, %22 : vector<8x32xf32>
    %24 = vector.broadcast %21 : vector<8x1xf32> to vector<8x32xf32>
    %25 = arith.mulf %23, %24 : vector<8x32xf32>
    %26 = vector.broadcast %4 : vector<1x32xf32> to vector<8x32xf32>
    %27 = arith.mulf %25, %26 : vector<8x32xf32>
    %28 = vector.broadcast %5 : vector<1x32xf32> to vector<8x32xf32>
    %29 = arith.addf %27, %28 : vector<8x32xf32>
    %c0_13 = arith.constant 0 : index
    %c0_14 = arith.constant 0 : index
    %c0_15 = arith.constant 0 : index
    %30 = vector.load %arg5[%c0_13, %c0_14, %c0_15] : memref<2x32x96xf32, #tpu.memory_space<vmem>>, vector<1x32x96xf32>
    %31 = vector.shape_cast %30 : vector<1x32x96xf32> to vector<32x96xf32>
    %cst_16 = arith.constant dense<0.000000e+00> : vector<8x96xf32>
    %32 = tpu.matmul %29, %31, %cst_16 {dimension_numbers = #tpu.dot_dimension_numbers<[1], [0], [0], [1], [0, 0, 1, 1], [], []>} : vector<8x32xf32>, vector<32x96xf32>, vector<8x96xf32> -> vector<8x96xf32>
    %c0_17 = arith.constant 0 : index
    %c0_18 = arith.constant 0 : index
    %c0_19 = arith.constant 0 : index
    %33 = vector.load %arg6[%c0_17, %c0_18, %c0_19] : memref<2x1x96xf32, #tpu.memory_space<vmem>>, vector<1x1x96xf32>
    %34 = vector.shape_cast %33 : vector<1x1x96xf32> to vector<1x96xf32>
    %35 = vector.broadcast %34 : vector<1x96xf32> to vector<8x96xf32>
    %36 = arith.addf %32, %35 : vector<8x96xf32>
    %c0_20 = arith.constant 0 : index
    %c0_21 = arith.constant 0 : index
    %c0_22 = arith.constant 0 : index
    %37 = vector.load %arg7[%c0_20, %c0_21, %c0_22] : memref<2x32x32xf32, #tpu.memory_space<vmem>>, vector<1x32x32xf32>
    %38 = vector.shape_cast %37 : vector<1x32x32xf32> to vector<32x32xf32>
    %cst_23 = arith.constant 0.000000e+00 : f32
    %39 = vector.broadcast %cst_23 : f32 to vector<8x32xf32>
    %40 = vector.extract_strided_slice %36 {offsets = [0, 0], sizes = [8, 16], strides = [1, 1]} : vector<8x96xf32> to vector<8x16xf32>
    %41 = vector.extract_strided_slice %36 {offsets = [0, 32], sizes = [8, 16], strides = [1, 1]} : vector<8x96xf32> to vector<8x16xf32>
    %42 = vector.extract_strided_slice %36 {offsets = [0, 64], sizes = [8, 16], strides = [1, 1]} : vector<8x96xf32> to vector<8x16xf32>
    %43 = tpu.transpose %41, [1, 0] : vector<8x16xf32> -> vector<16x8xf32>
    %cst_24 = arith.constant dense<0.000000e+00> : vector<8x8xf32>
    %44 = tpu.matmul %40, %43, %cst_24 {dimension_numbers = #tpu.dot_dimension_numbers<[1], [0], [0], [1], [0, 0, 1, 1], [], []>} : vector<8x16xf32>, vector<16x8xf32>, vector<8x8xf32> -> vector<8x8xf32>
    %cst_25 = arith.constant 2.500000e-01 : f32
    %45 = vector.broadcast %cst_25 : f32 to vector<8x8xf32>
    %46 = arith.mulf %44, %45 : vector<8x8xf32>
    %47 = vector.broadcast %3 : vector<1x8xf32> to vector<8x8xf32>
    %48 = arith.addf %46, %47 : vector<8x8xf32>
    %cst_26 = arith.constant dense<0xFF800000> : vector<8xf32>
    %49 = vector.multi_reduction <maximumf>, %48, %cst_26 [1] : vector<8x8xf32> to vector<8xf32>
    %50 = vector.shape_cast %49 : vector<8xf32> to vector<8x1xf32>
    %51 = vector.broadcast %50 : vector<8x1xf32> to vector<8x8xf32>
    %52 = arith.subf %48, %51 : vector<8x8xf32>
    %53 = math.exp %52 : vector<8x8xf32>
    %cst_27 = arith.constant dense<0.000000e+00> : vector<8xf32>
    %54 = vector.multi_reduction <add>, %53, %cst_27 [1] : vector<8x8xf32> to vector<8xf32>
    %55 = vector.shape_cast %54 : vector<8xf32> to vector<8x1xf32>
    %56 = tpu.reciprocal %55 {approx = true} : vector<8x1xf32> -> vector<8x1xf32>
    %57 = vector.broadcast %56 : vector<8x1xf32> to vector<8x8xf32>
    %58 = arith.mulf %53, %57 : vector<8x8xf32>
    %cst_28 = arith.constant dense<0.000000e+00> : vector<8x16xf32>
    %59 = tpu.matmul %58, %42, %cst_28 {dimension_numbers = #tpu.dot_dimension_numbers<[1], [0], [0], [1], [0, 0, 1, 1], [], []>} : vector<8x8xf32>, vector<8x16xf32>, vector<8x16xf32> -> vector<8x16xf32>
    %60 = vector.extract_strided_slice %38 {offsets = [0, 0], sizes = [16, 32], strides = [1, 1]} : vector<32x32xf32> to vector<16x32xf32>
    %cst_29 = arith.constant dense<0.000000e+00> : vector<8x32xf32>
    %61 = tpu.matmul %59, %60, %cst_29 {dimension_numbers = #tpu.dot_dimension_numbers<[1], [0], [0], [1], [0, 0, 1, 1], [], []>} : vector<8x16xf32>, vector<16x32xf32>, vector<8x32xf32> -> vector<8x32xf32>
    %62 = arith.addf %39, %61 : vector<8x32xf32>
    %63 = vector.extract_strided_slice %36 {offsets = [0, 16], sizes = [8, 16], strides = [1, 1]} : vector<8x96xf32> to vector<8x16xf32>
    %64 = vector.extract_strided_slice %36 {offsets = [0, 48], sizes = [8, 16], strides = [1, 1]} : vector<8x96xf32> to vector<8x16xf32>
    %65 = vector.extract_strided_slice %36 {offsets = [0, 80], sizes = [8, 16], strides = [1, 1]} : vector<8x96xf32> to vector<8x16xf32>
    %66 = tpu.transpose %64, [1, 0] : vector<8x16xf32> -> vector<16x8xf32>
    %cst_30 = arith.constant dense<0.000000e+00> : vector<8x8xf32>
    %67 = tpu.matmul %63, %66, %cst_30 {dimension_numbers = #tpu.dot_dimension_numbers<[1], [0], [0], [1], [0, 0, 1, 1], [], []>} : vector<8x16xf32>, vector<16x8xf32>, vector<8x8xf32> -> vector<8x8xf32>
    %cst_31 = arith.constant 2.500000e-01 : f32
    %68 = vector.broadcast %cst_31 : f32 to vector<8x8xf32>
    %69 = arith.mulf %67, %68 : vector<8x8xf32>
    %70 = vector.broadcast %3 : vector<1x8xf32> to vector<8x8xf32>
    %71 = arith.addf %69, %70 : vector<8x8xf32>
    %cst_32 = arith.constant dense<0xFF800000> : vector<8xf32>
    %72 = vector.multi_reduction <maximumf>, %71, %cst_32 [1] : vector<8x8xf32> to vector<8xf32>
    %73 = vector.shape_cast %72 : vector<8xf32> to vector<8x1xf32>
    %74 = vector.broadcast %73 : vector<8x1xf32> to vector<8x8xf32>
    %75 = arith.subf %71, %74 : vector<8x8xf32>
    %76 = math.exp %75 : vector<8x8xf32>
    %cst_33 = arith.constant dense<0.000000e+00> : vector<8xf32>
    %77 = vector.multi_reduction <add>, %76, %cst_33 [1] : vector<8x8xf32> to vector<8xf32>
    %78 = vector.shape_cast %77 : vector<8xf32> to vector<8x1xf32>
    %79 = tpu.reciprocal %78 {approx = true} : vector<8x1xf32> -> vector<8x1xf32>
    %80 = vector.broadcast %79 : vector<8x1xf32> to vector<8x8xf32>
    %81 = arith.mulf %76, %80 : vector<8x8xf32>
    %cst_34 = arith.constant dense<0.000000e+00> : vector<8x16xf32>
    %82 = tpu.matmul %81, %65, %cst_34 {dimension_numbers = #tpu.dot_dimension_numbers<[1], [0], [0], [1], [0, 0, 1, 1], [], []>} : vector<8x8xf32>, vector<8x16xf32>, vector<8x16xf32> -> vector<8x16xf32>
    %83 = vector.extract_strided_slice %38 {offsets = [16, 0], sizes = [16, 32], strides = [1, 1]} : vector<32x32xf32> to vector<16x32xf32>
    %cst_35 = arith.constant dense<0.000000e+00> : vector<8x32xf32>
    %84 = tpu.matmul %82, %83, %cst_35 {dimension_numbers = #tpu.dot_dimension_numbers<[1], [0], [0], [1], [0, 0, 1, 1], [], []>} : vector<8x16xf32>, vector<16x32xf32>, vector<8x32xf32> -> vector<8x32xf32>
    %85 = arith.addf %62, %84 : vector<8x32xf32>
    %c0_36 = arith.constant 0 : index
    %c0_37 = arith.constant 0 : index
    %c0_38 = arith.constant 0 : index
    %86 = vector.load %arg8[%c0_36, %c0_37, %c0_38] : memref<2x1x32xf32, #tpu.memory_space<vmem>>, vector<1x1x32xf32>
    %87 = vector.shape_cast %86 : vector<1x1x32xf32> to vector<1x32xf32>
    %88 = vector.broadcast %87 : vector<1x32xf32> to vector<8x32xf32>
    %89 = arith.addf %85, %88 : vector<8x32xf32>
    %90 = arith.addf %89, %29 : vector<8x32xf32>
    %c0_39 = arith.constant 0 : index
    %c0_40 = arith.constant 0 : index
    %c0_41 = arith.constant 0 : index
    %91 = vector.load %arg9[%c0_39, %c0_40, %c0_41] : memref<2x1x32xf32, #tpu.memory_space<vmem>>, vector<1x1x32xf32>
    %92 = vector.shape_cast %91 : vector<1x1x32xf32> to vector<1x32xf32>
    %c0_42 = arith.constant 0 : index
    %c0_43 = arith.constant 0 : index
    %c0_44 = arith.constant 0 : index
    %93 = vector.load %arg10[%c0_42, %c0_43, %c0_44] : memref<2x1x32xf32, #tpu.memory_space<vmem>>, vector<1x1x32xf32>
    %94 = vector.shape_cast %93 : vector<1x1x32xf32> to vector<1x32xf32>
    %cst_45 = arith.constant dense<0.000000e+00> : vector<8xf32>
    %95 = vector.multi_reduction <add>, %90, %cst_45 [1] : vector<8x32xf32> to vector<8xf32>
    %96 = vector.shape_cast %95 : vector<8xf32> to vector<8x1xf32>
    %cst_46 = arith.constant 3.200000e+01 : f32
    %97 = vector.broadcast %cst_46 : f32 to vector<8x1xf32>
    %98 = arith.divf %96, %97 : vector<8x1xf32>
    %99 = vector.broadcast %98 : vector<8x1xf32> to vector<8x32xf32>
    %100 = arith.subf %90, %99 : vector<8x32xf32>
    %101 = vector.broadcast %98 : vector<8x1xf32> to vector<8x32xf32>
    %102 = arith.subf %90, %101 : vector<8x32xf32>
    %103 = arith.mulf %100, %102 : vector<8x32xf32>
    %cst_47 = arith.constant dense<0.000000e+00> : vector<8xf32>
    %104 = vector.multi_reduction <add>, %103, %cst_47 [1] : vector<8x32xf32> to vector<8xf32>
    %105 = vector.shape_cast %104 : vector<8xf32> to vector<8x1xf32>
    %cst_48 = arith.constant 3.200000e+01 : f32
    %106 = vector.broadcast %cst_48 : f32 to vector<8x1xf32>
    %107 = arith.divf %105, %106 : vector<8x1xf32>
    %cst_49 = arith.constant 9.99999996E-13 : f32
    %108 = vector.broadcast %cst_49 : f32 to vector<8x1xf32>
    %109 = arith.addf %107, %108 : vector<8x1xf32>
    %110 = math.rsqrt %109 : vector<8x1xf32>
    %111 = vector.broadcast %98 : vector<8x1xf32> to vector<8x32xf32>
    %112 = arith.subf %90, %111 : vector<8x32xf32>
    %113 = vector.broadcast %110 : vector<8x1xf32> to vector<8x32xf32>
    %114 = arith.mulf %112, %113 : vector<8x32xf32>
    %115 = vector.broadcast %92 : vector<1x32xf32> to vector<8x32xf32>
    %116 = arith.mulf %114, %115 : vector<8x32xf32>
    %117 = vector.broadcast %94 : vector<1x32xf32> to vector<8x32xf32>
    %118 = arith.addf %116, %117 : vector<8x32xf32>
    %c0_50 = arith.constant 0 : index
    %c0_51 = arith.constant 0 : index
    %c0_52 = arith.constant 0 : index
    %119 = vector.load %arg11[%c0_50, %c0_51, %c0_52] : memref<2x32x64xf32, #tpu.memory_space<vmem>>, vector<1x32x64xf32>
    %120 = vector.shape_cast %119 : vector<1x32x64xf32> to vector<32x64xf32>
    %cst_53 = arith.constant dense<0.000000e+00> : vector<8x64xf32>
    %121 = tpu.matmul %118, %120, %cst_53 {dimension_numbers = #tpu.dot_dimension_numbers<[1], [0], [0], [1], [0, 0, 1, 1], [], []>} : vector<8x32xf32>, vector<32x64xf32>, vector<8x64xf32> -> vector<8x64xf32>
    %c0_54 = arith.constant 0 : index
    %c0_55 = arith.constant 0 : index
    %c0_56 = arith.constant 0 : index
    %122 = vector.load %arg12[%c0_54, %c0_55, %c0_56] : memref<2x1x64xf32, #tpu.memory_space<vmem>>, vector<1x1x64xf32>
    %123 = vector.shape_cast %122 : vector<1x1x64xf32> to vector<1x64xf32>
    %124 = vector.broadcast %123 : vector<1x64xf32> to vector<8x64xf32>
    %125 = arith.addf %121, %124 : vector<8x64xf32>
    %cst_57 = arith.constant 5.000000e-01 : f32
    %126 = vector.broadcast %cst_57 : f32 to vector<8x64xf32>
    %127 = arith.mulf %126, %125 : vector<8x64xf32>
    %cst_58 = arith.constant 4.471500e-02 : f32
    %128 = vector.broadcast %cst_58 : f32 to vector<8x64xf32>
    %129 = arith.mulf %128, %125 : vector<8x64xf32>
    %130 = arith.mulf %129, %125 : vector<8x64xf32>
    %131 = arith.mulf %130, %125 : vector<8x64xf32>
    %132 = arith.addf %125, %131 : vector<8x64xf32>
    %cst_59 = arith.constant 0.797884583 : f32
    %133 = vector.broadcast %cst_59 : f32 to vector<8x64xf32>
    %134 = arith.mulf %133, %132 : vector<8x64xf32>
    %135 = math.tanh %134 : vector<8x64xf32>
    %cst_60 = arith.constant 1.000000e+00 : f32
    %136 = vector.broadcast %cst_60 : f32 to vector<8x64xf32>
    %137 = arith.addf %136, %135 : vector<8x64xf32>
    %138 = arith.mulf %127, %137 : vector<8x64xf32>
    %c0_61 = arith.constant 0 : index
    %c0_62 = arith.constant 0 : index
    %c0_63 = arith.constant 0 : index
    %139 = vector.load %arg13[%c0_61, %c0_62, %c0_63] : memref<2x64x32xf32, #tpu.memory_space<vmem>>, vector<1x64x32xf32>
    %140 = vector.shape_cast %139 : vector<1x64x32xf32> to vector<64x32xf32>
    %cst_64 = arith.constant dense<0.000000e+00> : vector<8x32xf32>
    %141 = tpu.matmul %138, %140, %cst_64 {dimension_numbers = #tpu.dot_dimension_numbers<[1], [0], [0], [1], [0, 0, 1, 1], [], []>} : vector<8x64xf32>, vector<64x32xf32>, vector<8x32xf32> -> vector<8x32xf32>
    %c0_65 = arith.constant 0 : index
    %c0_66 = arith.constant 0 : index
    %c0_67 = arith.constant 0 : index
    %142 = vector.load %arg14[%c0_65, %c0_66, %c0_67] : memref<2x1x32xf32, #tpu.memory_space<vmem>>, vector<1x1x32xf32>
    %143 = vector.shape_cast %142 : vector<1x1x32xf32> to vector<1x32xf32>
    %144 = vector.broadcast %143 : vector<1x32xf32> to vector<8x32xf32>
    %145 = arith.addf %141, %144 : vector<8x32xf32>
    %146 = arith.addf %145, %118 : vector<8x32xf32>
    %c0_68 = arith.constant 0 : index
    %c0_69 = arith.constant 0 : index
    %c0_70 = arith.constant 0 : index
    %147 = vector.load %arg15[%c0_68, %c0_69, %c0_70] : memref<2x1x32xf32, #tpu.memory_space<vmem>>, vector<1x1x32xf32>
    %148 = vector.shape_cast %147 : vector<1x1x32xf32> to vector<1x32xf32>
    %c0_71 = arith.constant 0 : index
    %c0_72 = arith.constant 0 : index
    %c0_73 = arith.constant 0 : index
    %149 = vector.load %arg16[%c0_71, %c0_72, %c0_73] : memref<2x1x32xf32, #tpu.memory_space<vmem>>, vector<1x1x32xf32>
    %150 = vector.shape_cast %149 : vector<1x1x32xf32> to vector<1x32xf32>
    %cst_74 = arith.constant dense<0.000000e+00> : vector<8xf32>
    %151 = vector.multi_reduction <add>, %146, %cst_74 [1] : vector<8x32xf32> to vector<8xf32>
    %152 = vector.shape_cast %151 : vector<8xf32> to vector<8x1xf32>
    %cst_75 = arith.constant 3.200000e+01 : f32
    %153 = vector.broadcast %cst_75 : f32 to vector<8x1xf32>
    %154 = arith.divf %152, %153 : vector<8x1xf32>
    %155 = vector.broadcast %154 : vector<8x1xf32> to vector<8x32xf32>
    %156 = arith.subf %146, %155 : vector<8x32xf32>
    %157 = vector.broadcast %154 : vector<8x1xf32> to vector<8x32xf32>
    %158 = arith.subf %146, %157 : vector<8x32xf32>
    %159 = arith.mulf %156, %158 : vector<8x32xf32>
    %cst_76 = arith.constant dense<0.000000e+00> : vector<8xf32>
    %160 = vector.multi_reduction <add>, %159, %cst_76 [1] : vector<8x32xf32> to vector<8xf32>
    %161 = vector.shape_cast %160 : vector<8xf32> to vector<8x1xf32>
    %cst_77 = arith.constant 3.200000e+01 : f32
    %162 = vector.broadcast %cst_77 : f32 to vector<8x1xf32>
    %163 = arith.divf %161, %162 : vector<8x1xf32>
    %cst_78 = arith.constant 9.99999996E-13 : f32
    %164 = vector.broadcast %cst_78 : f32 to vector<8x1xf32>
    %165 = arith.addf %163, %164 : vector<8x1xf32>
    %166 = math.rsqrt %165 : vector<8x1xf32>
    %167 = vector.broadcast %154 : vector<8x1xf32> to vector<8x32xf32>
    %168 = arith.subf %146, %167 : vector<8x32xf32>
    %169 = vector.broadcast %166 : vector<8x1xf32> to vector<8x32xf32>
    %170 = arith.mulf %168, %169 : vector<8x32xf32>
    %171 = vector.broadcast %148 : vector<1x32xf32> to vector<8x32xf32>
    %172 = arith.mulf %170, %171 : vector<8x32xf32>
    %173 = vector.broadcast %150 : vector<1x32xf32> to vector<8x32xf32>
    %174 = arith.addf %172, %173 : vector<8x32xf32>
    %c1 = arith.constant 1 : index
    %c0_79 = arith.constant 0 : index
    %c0_80 = arith.constant 0 : index
    %175 = vector.load %arg5[%c1, %c0_79, %c0_80] : memref<2x32x96xf32, #tpu.memory_space<vmem>>, vector<1x32x96xf32>
    %176 = vector.shape_cast %175 : vector<1x32x96xf32> to vector<32x96xf32>
    %cst_81 = arith.constant dense<0.000000e+00> : vector<8x96xf32>
    %177 = tpu.matmul %174, %176, %cst_81 {dimension_numbers = #tpu.dot_dimension_numbers<[1], [0], [0], [1], [0, 0, 1, 1], [], []>} : vector<8x32xf32>, vector<32x96xf32>, vector<8x96xf32> -> vector<8x96xf32>
    %c1_82 = arith.constant 1 : index
    %c0_83 = arith.constant 0 : index
    %c0_84 = arith.constant 0 : index
    %178 = vector.load %arg6[%c1_82, %c0_83, %c0_84] : memref<2x1x96xf32, #tpu.memory_space<vmem>>, vector<1x1x96xf32>
    %179 = vector.shape_cast %178 : vector<1x1x96xf32> to vector<1x96xf32>
    %180 = vector.broadcast %179 : vector<1x96xf32> to vector<8x96xf32>
    %181 = arith.addf %177, %180 : vector<8x96xf32>
    %c1_85 = arith.constant 1 : index
    %c0_86 = arith.constant 0 : index
    %c0_87 = arith.constant 0 : index
    %182 = vector.load %arg7[%c1_85, %c0_86, %c0_87] : memref<2x32x32xf32, #tpu.memory_space<vmem>>, vector<1x32x32xf32>
    %183 = vector.shape_cast %182 : vector<1x32x32xf32> to vector<32x32xf32>
    %cst_88 = arith.constant 0.000000e+00 : f32
    %184 = vector.broadcast %cst_88 : f32 to vector<8x32xf32>
    %185 = vector.extract_strided_slice %181 {offsets = [0, 0], sizes = [8, 16], strides = [1, 1]} : vector<8x96xf32> to vector<8x16xf32>
    %186 = vector.extract_strided_slice %181 {offsets = [0, 32], sizes = [8, 16], strides = [1, 1]} : vector<8x96xf32> to vector<8x16xf32>
    %187 = vector.extract_strided_slice %181 {offsets = [0, 64], sizes = [8, 16], strides = [1, 1]} : vector<8x96xf32> to vector<8x16xf32>
    %188 = tpu.transpose %186, [1, 0] : vector<8x16xf32> -> vector<16x8xf32>
    %cst_89 = arith.constant dense<0.000000e+00> : vector<8x8xf32>
    %189 = tpu.matmul %185, %188, %cst_89 {dimension_numbers = #tpu.dot_dimension_numbers<[1], [0], [0], [1], [0, 0, 1, 1], [], []>} : vector<8x16xf32>, vector<16x8xf32>, vector<8x8xf32> -> vector<8x8xf32>
    %cst_90 = arith.constant 2.500000e-01 : f32
    %190 = vector.broadcast %cst_90 : f32 to vector<8x8xf32>
    %191 = arith.mulf %189, %190 : vector<8x8xf32>
    %192 = vector.broadcast %3 : vector<1x8xf32> to vector<8x8xf32>
    %193 = arith.addf %191, %192 : vector<8x8xf32>
    %cst_91 = arith.constant dense<0xFF800000> : vector<8xf32>
    %194 = vector.multi_reduction <maximumf>, %193, %cst_91 [1] : vector<8x8xf32> to vector<8xf32>
    %195 = vector.shape_cast %194 : vector<8xf32> to vector<8x1xf32>
    %196 = vector.broadcast %195 : vector<8x1xf32> to vector<8x8xf32>
    %197 = arith.subf %193, %196 : vector<8x8xf32>
    %198 = math.exp %197 : vector<8x8xf32>
    %cst_92 = arith.constant dense<0.000000e+00> : vector<8xf32>
    %199 = vector.multi_reduction <add>, %198, %cst_92 [1] : vector<8x8xf32> to vector<8xf32>
    %200 = vector.shape_cast %199 : vector<8xf32> to vector<8x1xf32>
    %201 = tpu.reciprocal %200 {approx = true} : vector<8x1xf32> -> vector<8x1xf32>
    %202 = vector.broadcast %201 : vector<8x1xf32> to vector<8x8xf32>
    %203 = arith.mulf %198, %202 : vector<8x8xf32>
    %cst_93 = arith.constant dense<0.000000e+00> : vector<8x16xf32>
    %204 = tpu.matmul %203, %187, %cst_93 {dimension_numbers = #tpu.dot_dimension_numbers<[1], [0], [0], [1], [0, 0, 1, 1], [], []>} : vector<8x8xf32>, vector<8x16xf32>, vector<8x16xf32> -> vector<8x16xf32>
    %205 = vector.extract_strided_slice %183 {offsets = [0, 0], sizes = [16, 32], strides = [1, 1]} : vector<32x32xf32> to vector<16x32xf32>
    %cst_94 = arith.constant dense<0.000000e+00> : vector<8x32xf32>
    %206 = tpu.matmul %204, %205, %cst_94 {dimension_numbers = #tpu.dot_dimension_numbers<[1], [0], [0], [1], [0, 0, 1, 1], [], []>} : vector<8x16xf32>, vector<16x32xf32>, vector<8x32xf32> -> vector<8x32xf32>
    %207 = arith.addf %184, %206 : vector<8x32xf32>
    %208 = vector.extract_strided_slice %181 {offsets = [0, 16], sizes = [8, 16], strides = [1, 1]} : vector<8x96xf32> to vector<8x16xf32>
    %209 = vector.extract_strided_slice %181 {offsets = [0, 48], sizes = [8, 16], strides = [1, 1]} : vector<8x96xf32> to vector<8x16xf32>
    %210 = vector.extract_strided_slice %181 {offsets = [0, 80], sizes = [8, 16], strides = [1, 1]} : vector<8x96xf32> to vector<8x16xf32>
    %211 = tpu.transpose %209, [1, 0] : vector<8x16xf32> -> vector<16x8xf32>
    %cst_95 = arith.constant dense<0.000000e+00> : vector<8x8xf32>
    %212 = tpu.matmul %208, %211, %cst_95 {dimension_numbers = #tpu.dot_dimension_numbers<[1], [0], [0], [1], [0, 0, 1, 1], [], []>} : vector<8x16xf32>, vector<16x8xf32>, vector<8x8xf32> -> vector<8x8xf32>
    %cst_96 = arith.constant 2.500000e-01 : f32
    %213 = vector.broadcast %cst_96 : f32 to vector<8x8xf32>
    %214 = arith.mulf %212, %213 : vector<8x8xf32>
    %215 = vector.broadcast %3 : vector<1x8xf32> to vector<8x8xf32>
    %216 = arith.addf %214, %215 : vector<8x8xf32>
    %cst_97 = arith.constant dense<0xFF800000> : vector<8xf32>
    %217 = vector.multi_reduction <maximumf>, %216, %cst_97 [1] : vector<8x8xf32> to vector<8xf32>
    %218 = vector.shape_cast %217 : vector<8xf32> to vector<8x1xf32>
    %219 = vector.broadcast %218 : vector<8x1xf32> to vector<8x8xf32>
    %220 = arith.subf %216, %219 : vector<8x8xf32>
    %221 = math.exp %220 : vector<8x8xf32>
    %cst_98 = arith.constant dense<0.000000e+00> : vector<8xf32>
    %222 = vector.multi_reduction <add>, %221, %cst_98 [1] : vector<8x8xf32> to vector<8xf32>
    %223 = vector.shape_cast %222 : vector<8xf32> to vector<8x1xf32>
    %224 = tpu.reciprocal %223 {approx = true} : vector<8x1xf32> -> vector<8x1xf32>
    %225 = vector.broadcast %224 : vector<8x1xf32> to vector<8x8xf32>
    %226 = arith.mulf %221, %225 : vector<8x8xf32>
    %cst_99 = arith.constant dense<0.000000e+00> : vector<8x16xf32>
    %227 = tpu.matmul %226, %210, %cst_99 {dimension_numbers = #tpu.dot_dimension_numbers<[1], [0], [0], [1], [0, 0, 1, 1], [], []>} : vector<8x8xf32>, vector<8x16xf32>, vector<8x16xf32> -> vector<8x16xf32>
    %228 = vector.extract_strided_slice %183 {offsets = [16, 0], sizes = [16, 32], strides = [1, 1]} : vector<32x32xf32> to vector<16x32xf32>
    %cst_100 = arith.constant dense<0.000000e+00> : vector<8x32xf32>
    %229 = tpu.matmul %227, %228, %cst_100 {dimension_numbers = #tpu.dot_dimension_numbers<[1], [0], [0], [1], [0, 0, 1, 1], [], []>} : vector<8x16xf32>, vector<16x32xf32>, vector<8x32xf32> -> vector<8x32xf32>
    %230 = arith.addf %207, %229 : vector<8x32xf32>
    %c1_101 = arith.constant 1 : index
    %c0_102 = arith.constant 0 : index
    %c0_103 = arith.constant 0 : index
    %231 = vector.load %arg8[%c1_101, %c0_102, %c0_103] : memref<2x1x32xf32, #tpu.memory_space<vmem>>, vector<1x1x32xf32>
    %232 = vector.shape_cast %231 : vector<1x1x32xf32> to vector<1x32xf32>
    %233 = vector.broadcast %232 : vector<1x32xf32> to vector<8x32xf32>
    %234 = arith.addf %230, %233 : vector<8x32xf32>
    %235 = arith.addf %234, %174 : vector<8x32xf32>
    %c1_104 = arith.constant 1 : index
    %c0_105 = arith.constant 0 : index
    %c0_106 = arith.constant 0 : index
    %236 = vector.load %arg9[%c1_104, %c0_105, %c0_106] : memref<2x1x32xf32, #tpu.memory_space<vmem>>, vector<1x1x32xf32>
    %237 = vector.shape_cast %236 : vector<1x1x32xf32> to vector<1x32xf32>
    %c1_107 = arith.constant 1 : index
    %c0_108 = arith.constant 0 : index
    %c0_109 = arith.constant 0 : index
    %238 = vector.load %arg10[%c1_107, %c0_108, %c0_109] : memref<2x1x32xf32, #tpu.memory_space<vmem>>, vector<1x1x32xf32>
    %239 = vector.shape_cast %238 : vector<1x1x32xf32> to vector<1x32xf32>
    %cst_110 = arith.constant dense<0.000000e+00> : vector<8xf32>
    %240 = vector.multi_reduction <add>, %235, %cst_110 [1] : vector<8x32xf32> to vector<8xf32>
    %241 = vector.shape_cast %240 : vector<8xf32> to vector<8x1xf32>
    %cst_111 = arith.constant 3.200000e+01 : f32
    %242 = vector.broadcast %cst_111 : f32 to vector<8x1xf32>
    %243 = arith.divf %241, %242 : vector<8x1xf32>
    %244 = vector.broadcast %243 : vector<8x1xf32> to vector<8x32xf32>
    %245 = arith.subf %235, %244 : vector<8x32xf32>
    %246 = vector.broadcast %243 : vector<8x1xf32> to vector<8x32xf32>
    %247 = arith.subf %235, %246 : vector<8x32xf32>
    %248 = arith.mulf %245, %247 : vector<8x32xf32>
    %cst_112 = arith.constant dense<0.000000e+00> : vector<8xf32>
    %249 = vector.multi_reduction <add>, %248, %cst_112 [1] : vector<8x32xf32> to vector<8xf32>
    %250 = vector.shape_cast %249 : vector<8xf32> to vector<8x1xf32>
    %cst_113 = arith.constant 3.200000e+01 : f32
    %251 = vector.broadcast %cst_113 : f32 to vector<8x1xf32>
    %252 = arith.divf %250, %251 : vector<8x1xf32>
    %cst_114 = arith.constant 9.99999996E-13 : f32
    %253 = vector.broadcast %cst_114 : f32 to vector<8x1xf32>
    %254 = arith.addf %252, %253 : vector<8x1xf32>
    %255 = math.rsqrt %254 : vector<8x1xf32>
    %256 = vector.broadcast %243 : vector<8x1xf32> to vector<8x32xf32>
    %257 = arith.subf %235, %256 : vector<8x32xf32>
    %258 = vector.broadcast %255 : vector<8x1xf32> to vector<8x32xf32>
    %259 = arith.mulf %257, %258 : vector<8x32xf32>
    %260 = vector.broadcast %237 : vector<1x32xf32> to vector<8x32xf32>
    %261 = arith.mulf %259, %260 : vector<8x32xf32>
    %262 = vector.broadcast %239 : vector<1x32xf32> to vector<8x32xf32>
    %263 = arith.addf %261, %262 : vector<8x32xf32>
    %c1_115 = arith.constant 1 : index
    %c0_116 = arith.constant 0 : index
    %c0_117 = arith.constant 0 : index
    %264 = vector.load %arg11[%c1_115, %c0_116, %c0_117] : memref<2x32x64xf32, #tpu.memory_space<vmem>>, vector<1x32x64xf32>
    %265 = vector.shape_cast %264 : vector<1x32x64xf32> to vector<32x64xf32>
    %cst_118 = arith.constant dense<0.000000e+00> : vector<8x64xf32>
    %266 = tpu.matmul %263, %265, %cst_118 {dimension_numbers = #tpu.dot_dimension_numbers<[1], [0], [0], [1], [0, 0, 1, 1], [], []>} : vector<8x32xf32>, vector<32x64xf32>, vector<8x64xf32> -> vector<8x64xf32>
    %c1_119 = arith.constant 1 : index
    %c0_120 = arith.constant 0 : index
    %c0_121 = arith.constant 0 : index
    %267 = vector.load %arg12[%c1_119, %c0_120, %c0_121] : memref<2x1x64xf32, #tpu.memory_space<vmem>>, vector<1x1x64xf32>
    %268 = vector.shape_cast %267 : vector<1x1x64xf32> to vector<1x64xf32>
    %269 = vector.broadcast %268 : vector<1x64xf32> to vector<8x64xf32>
    %270 = arith.addf %266, %269 : vector<8x64xf32>
    %cst_122 = arith.constant 5.000000e-01 : f32
    %271 = vector.broadcast %cst_122 : f32 to vector<8x64xf32>
    %272 = arith.mulf %271, %270 : vector<8x64xf32>
    %cst_123 = arith.constant 4.471500e-02 : f32
    %273 = vector.broadcast %cst_123 : f32 to vector<8x64xf32>
    %274 = arith.mulf %273, %270 : vector<8x64xf32>
    %275 = arith.mulf %274, %270 : vector<8x64xf32>
    %276 = arith.mulf %275, %270 : vector<8x64xf32>
    %277 = arith.addf %270, %276 : vector<8x64xf32>
    %cst_124 = arith.constant 0.797884583 : f32
    %278 = vector.broadcast %cst_124 : f32 to vector<8x64xf32>
    %279 = arith.mulf %278, %277 : vector<8x64xf32>
    %280 = math.tanh %279 : vector<8x64xf32>
    %cst_125 = arith.constant 1.000000e+00 : f32
    %281 = vector.broadcast %cst_125 : f32 to vector<8x64xf32>
    %282 = arith.addf %281, %280 : vector<8x64xf32>
    %283 = arith.mulf %272, %282 : vector<8x64xf32>
    %c1_126 = arith.constant 1 : index
    %c0_127 = arith.constant 0 : index
    %c0_128 = arith.constant 0 : index
    %284 = vector.load %arg13[%c1_126, %c0_127, %c0_128] : memref<2x64x32xf32, #tpu.memory_space<vmem>>, vector<1x64x32xf32>
    %285 = vector.shape_cast %284 : vector<1x64x32xf32> to vector<64x32xf32>
    %cst_129 = arith.constant dense<0.000000e+00> : vector<8x32xf32>
    %286 = tpu.matmul %283, %285, %cst_129 {dimension_numbers = #tpu.dot_dimension_numbers<[1], [0], [0], [1], [0, 0, 1, 1], [], []>} : vector<8x64xf32>, vector<64x32xf32>, vector<8x32xf32> -> vector<8x32xf32>
    %c1_130 = arith.constant 1 : index
    %c0_131 = arith.constant 0 : index
    %c0_132 = arith.constant 0 : index
    %287 = vector.load %arg14[%c1_130, %c0_131, %c0_132] : memref<2x1x32xf32, #tpu.memory_space<vmem>>, vector<1x1x32xf32>
    %288 = vector.shape_cast %287 : vector<1x1x32xf32> to vector<1x32xf32>
    %289 = vector.broadcast %288 : vector<1x32xf32> to vector<8x32xf32>
    %290 = arith.addf %286, %289 : vector<8x32xf32>
    %291 = arith.addf %290, %263 : vector<8x32xf32>
    %c1_133 = arith.constant 1 : index
    %c0_134 = arith.constant 0 : index
    %c0_135 = arith.constant 0 : index
    %292 = vector.load %arg15[%c1_133, %c0_134, %c0_135] : memref<2x1x32xf32, #tpu.memory_space<vmem>>, vector<1x1x32xf32>
    %293 = vector.shape_cast %292 : vector<1x1x32xf32> to vector<1x32xf32>
    %c1_136 = arith.constant 1 : index
    %c0_137 = arith.constant 0 : index
    %c0_138 = arith.constant 0 : index
    %294 = vector.load %arg16[%c1_136, %c0_137, %c0_138] : memref<2x1x32xf32, #tpu.memory_space<vmem>>, vector<1x1x32xf32>
    %295 = vector.shape_cast %294 : vector<1x1x32xf32> to vector<1x32xf32>
    %cst_139 = arith.constant dense<0.000000e+00> : vector<8xf32>
    %296 = vector.multi_reduction <add>, %291, %cst_139 [1] : vector<8x32xf32> to vector<8xf32>
    %297 = vector.shape_cast %296 : vector<8xf32> to vector<8x1xf32>
    %cst_140 = arith.constant 3.200000e+01 : f32
    %298 = vector.broadcast %cst_140 : f32 to vector<8x1xf32>
    %299 = arith.divf %297, %298 : vector<8x1xf32>
    %300 = vector.broadcast %299 : vector<8x1xf32> to vector<8x32xf32>
    %301 = arith.subf %291, %300 : vector<8x32xf32>
    %302 = vector.broadcast %299 : vector<8x1xf32> to vector<8x32xf32>
    %303 = arith.subf %291, %302 : vector<8x32xf32>
    %304 = arith.mulf %301, %303 : vector<8x32xf32>
    %cst_141 = arith.constant dense<0.000000e+00> : vector<8xf32>
    %305 = vector.multi_reduction <add>, %304, %cst_141 [1] : vector<8x32xf32> to vector<8xf32>
    %306 = vector.shape_cast %305 : vector<8xf32> to vector<8x1xf32>
    %cst_142 = arith.constant 3.200000e+01 : f32
    %307 = vector.broadcast %cst_142 : f32 to vector<8x1xf32>
    %308 = arith.divf %306, %307 : vector<8x1xf32>
    %cst_143 = arith.constant 9.99999996E-13 : f32
    %309 = vector.broadcast %cst_143 : f32 to vector<8x1xf32>
    %310 = arith.addf %308, %309 : vector<8x1xf32>
    %311 = math.rsqrt %310 : vector<8x1xf32>
    %312 = vector.broadcast %299 : vector<8x1xf32> to vector<8x32xf32>
    %313 = arith.subf %291, %312 : vector<8x32xf32>
    %314 = vector.broadcast %311 : vector<8x1xf32> to vector<8x32xf32>
    %315 = arith.mulf %313, %314 : vector<8x32xf32>
    %316 = vector.broadcast %293 : vector<1x32xf32> to vector<8x32xf32>
    %317 = arith.mulf %315, %316 : vector<8x32xf32>
    %318 = vector.broadcast %295 : vector<1x32xf32> to vector<8x32xf32>
    %319 = arith.addf %317, %318 : vector<8x32xf32>
    %c0_144 = arith.constant 0 : index
    %c0_145 = arith.constant 0 : index
    %c0_146 = arith.constant 0 : index
    %320 = vector.load %arg17[%c0_144, %c0_145, %c0_146] : memref<1x8x32xf32, #tpu.memory_space<vmem>>, vector<1x8x32xf32>
    %321 = vector.shape_cast %320 : vector<1x8x32xf32> to vector<8x32xf32>
    %322 = vector.shape_cast %319 : vector<8x32xf32> to vector<1x8x32xf32>
    tpu.vector_store %arg17[%c0_144, %c0_145, %c0_146], %322 {strides = array<i32>} : memref<1x8x32xf32, #tpu.memory_space<vmem>>, vector<1x8x32xf32>,
    return
  }
  func.func @transform_0(%arg0: i32) -> (i32, i32, i32) {
    %c0_i32 = arith.constant 0 : i32
    %c0_i32_0 = arith.constant 0 : i32
    %c0_i32_1 = arith.constant 0 : i32
    return %arg0, %c0_i32, %c0_i32_0 : i32, i32, i32
  }
  func.func @transform_1(%arg0: i32) -> (i32, i32, i32) {
    %c0_i32 = arith.constant 0 : i32
    %c0_i32_0 = arith.constant 0 : i32
    %c0_i32_1 = arith.constant 0 : i32
    return %arg0, %c0_i32, %c0_i32_0 : i32, i32, i32
  }
  func.func @transform_2(%arg0: i32) -> (i32, i32) {
    %c0_i32 = arith.constant 0 : i32
    %c0_i32_0 = arith.constant 0 : i32
    %c0_i32_1 = arith.constant 0 : i32
    return %c0_i32, %c0_i32_0 : i32, i32
  }
  func.func @transform_3(%arg0: i32) -> (i32, i32) {
    %c0_i32 = arith.constant 0 : i32
    %c0_i32_0 = arith.constant 0 : i32
    %c0_i32_1 = arith.constant 0 : i32
    return %c0_i32, %c0_i32_0 : i32, i32
  }
  func.func @transform_4(%arg0: i32) -> (i32, i32, i32) {
    %c0_i32 = arith.constant 0 : i32
    %c0_i32_0 = arith.constant 0 : i32
    %c0_i32_1 = arith.constant 0 : i32
    %c0_i32_2 = arith.constant 0 : i32
    return %c0_i32, %c0_i32_0, %c0_i32_1 : i32, i32, i32
  }
  func.func @transform_5(%arg0: i32) -> (i32, i32, i32) {
    %c0_i32 = arith.constant 0 : i32
    %c0_i32_0 = arith.constant 0 : i32
    %c0_i32_1 = arith.constant 0 : i32
    %c0_i32_2 = arith.constant 0 : i32
    return %c0_i32, %c0_i32_0, %c0_i32_1 : i32, i32, i32
  }
  func.func @transform_6(%arg0: i32) -> (i32, i32, i32) {
    %c0_i32 = arith.constant 0 : i32
    %c0_i32_0 = arith.constant 0 : i32
    %c0_i32_1 = arith.constant 0 : i32
    %c0_i32_2 = arith.constant 0 : i32
    return %c0_i32, %c0_i32_0, %c0_i32_1 : i32, i32, i32
  }
  func.func @transform_7(%arg0: i32) -> (i32, i32, i32) {
    %c0_i32 = arith.constant 0 : i32
    %c0_i32_0 = arith.constant 0 : i32
    %c0_i32_1 = arith.constant 0 : i32
    %c0_i32_2 = arith.constant 0 : i32
    return %c0_i32, %c0_i32_0, %c0_i32_1 : i32, i32, i32
  }
  func.func @transform_8(%arg0: i32) -> (i32, i32, i32) {
    %c0_i32 = arith.constant 0 : i32
    %c0_i32_0 = arith.constant 0 : i32
    %c0_i32_1 = arith.constant 0 : i32
    %c0_i32_2 = arith.constant 0 : i32
    return %c0_i32, %c0_i32_0, %c0_i32_1 : i32, i32, i32
  }
  func.func @transform_9(%arg0: i32) -> (i32, i32, i32) {
    %c0_i32 = arith.constant 0 : i32
    %c0_i32_0 = arith.constant 0 : i32
    %c0_i32_1 = arith.constant 0 : i32
    %c0_i32_2 = arith.constant 0 : i32
    return %c0_i32, %c0_i32_0, %c0_i32_1 : i32, i32, i32
  }
  func.func @transform_10(%arg0: i32) -> (i32, i32, i32) {
    %c0_i32 = arith.constant 0 : i32
    %c0_i32_0 = arith.constant 0 : i32
    %c0_i32_1 = arith.constant 0 : i32
    %c0_i32_2 = arith.constant 0 : i32
    return %c0_i32, %c0_i32_0, %c0_i32_1 : i32, i32, i32
  }
  func.func @transform_11(%arg0: i32) -> (i32, i32, i32) {
    %c0_i32 = arith.constant 0 : i32
    %c0_i32_0 = arith.constant 0 : i32
    %c0_i32_1 = arith.constant 0 : i32
    %c0_i32_2 = arith.constant 0 : i32
    return %c0_i32, %c0_i32_0, %c0_i32_1 : i32, i32, i32
  }
  func.func @transform_12(%arg0: i32) -> (i32, i32, i32) {
    %c0_i32 = arith.constant 0 : i32
    %c0_i32_0 = arith.constant 0 : i32
    %c0_i32_1 = arith.constant 0 : i32
    %c0_i32_2 = arith.constant 0 : i32
    return %c0_i32, %c0_i32_0, %c0_i32_1 : i32, i32, i32
  }
  func.func @transform_13(%arg0: i32) -> (i32, i32, i32) {
    %c0_i32 = arith.constant 0 : i32
    %c0_i32_0 = arith.constant 0 : i32
    %c0_i32_1 = arith.constant 0 : i32
    %c0_i32_2 = arith.constant 0 : i32
    return %c0_i32, %c0_i32_0, %c0_i32_1 : i32, i32, i32
  }
  func.func @transform_14(%arg0: i32) -> (i32, i32, i32) {
    %c0_i32 = arith.constant 0 : i32
    %c0_i32_0 = arith.constant 0 : i32
    %c0_i32_1 = arith.constant 0 : i32
    %c0_i32_2 = arith.constant 0 : i32
    return %c0_i32, %c0_i32_0, %c0_i32_1 : i32, i32, i32
  }
  func.func @transform_15(%arg0: i32) -> (i32, i32, i32) {
    %c0_i32 = arith.constant 0 : i32
    %c0_i32_0 = arith.constant 0 : i32
    %c0_i32_1 = arith.constant 0 : i32
    %c0_i32_2 = arith.constant 0 : i32
    return %c0_i32, %c0_i32_0, %c0_i32_1 : i32, i32, i32
  }
  func.func @transform_16(%arg0: i32) -> (i32, i32, i32) {
    %c0_i32 = arith.constant 0 : i32
    %c0_i32_0 = arith.constant 0 : i32
    %c0_i32_1 = arith.constant 0 : i32
    return %arg0, %c0_i32, %c0_i32_0 : i32, i32, i32
  }
}

module attributes {stable_mosaic.version = 11 : i64} {
  func.func @_head_kernel(%arg0: i32, %arg1: memref<2x8x32xf32, #tpu.memory_space<vmem>>, %arg2: memref<2x8xf32, #tpu.memory_space<vmem>>, %arg3: memref<2x64xf32, #tpu.memory_space<vmem>>, %arg4: memref<96x7xf32, #tpu.memory_space<vmem>>, %arg5: memref<1x7xf32, #tpu.memory_space<vmem>>, %arg6: memref<2x3xf32, #tpu.memory_space<vmem>>, %arg7: memref<2x4xf32, #tpu.memory_space<vmem>>) attributes {dimension_semantics = [#tpu.dimension_semantics<arbitrary>], iteration_bounds = array<i64: 1>, scalar_prefetch = 0 : i64, scratch_operands = 0 : i64, tpu.core_type = #tpu.core_type<tc>, window_params = [{pipeline_mode = #tpu.pipeline_mode<synchronous>, transform_indices = @transform_0, window_bounds = array<i64: 2, 8, 32>}, {pipeline_mode = #tpu.pipeline_mode<synchronous>, transform_indices = @transform_1, window_bounds = array<i64: 2, 8>}, {pipeline_mode = #tpu.pipeline_mode<synchronous>, transform_indices = @transform_2, window_bounds = array<i64: 2, 64>}, {pipeline_mode = #tpu.pipeline_mode<synchronous>, transform_indices = @transform_3, window_bounds = array<i64: 96, 7>}, {pipeline_mode = #tpu.pipeline_mode<synchronous>, transform_indices = @transform_4, window_bounds = array<i64: 1, 7>}, {pipeline_mode = #tpu.pipeline_mode<synchronous>, transform_indices = @transform_5, window_bounds = array<i64: 2, 3>}, {pipeline_mode = #tpu.pipeline_mode<synchronous>, transform_indices = @transform_6, window_bounds = array<i64: 2, 4>}]} {
    %c0 = arith.constant 0 : index
    %c0_0 = arith.constant 0 : index
    %c0_1 = arith.constant 0 : index
    %0 = vector.load %arg1[%c0, %c0_0, %c0_1] : memref<2x8x32xf32, #tpu.memory_space<vmem>>, vector<2x8x32xf32>
    %c0_2 = arith.constant 0 : index
    %c0_3 = arith.constant 0 : index
    %1 = vector.load %arg2[%c0_2, %c0_3] : memref<2x8xf32, #tpu.memory_space<vmem>>, vector<2x8xf32>
    %2 = vector.shape_cast %1 : vector<2x8xf32> to vector<2x8x1xf32>
    %3 = vector.broadcast %2 : vector<2x8x1xf32> to vector<2x8x32xf32>
    %4 = arith.addf %0, %3 : vector<2x8x32xf32>
    %cst = arith.constant dense<0xFF800000> : vector<2x32xf32>
    %5 = vector.multi_reduction <maximumf>, %4, %cst [1] : vector<2x8x32xf32> to vector<2x32xf32>
    %c0_4 = arith.constant 0 : index
    %c0_5 = arith.constant 0 : index
    %6 = vector.load %arg4[%c0_4, %c0_5] : memref<96x7xf32, #tpu.memory_space<vmem>>, vector<96x7xf32>
    %7 = vector.extract_strided_slice %6 {offsets = [0, 0], sizes = [32, 7], strides = [1, 1]} : vector<96x7xf32> to vector<32x7xf32>
    %cst_6 = arith.constant dense<0.000000e+00> : vector<2x7xf32>
    %8 = tpu.matmul %5, %7, %cst_6 {dimension_numbers = #tpu.dot_dimension_numbers<[1], [0], [0], [1], [0, 0, 1, 1], [], []>} : vector<2x32xf32>, vector<32x7xf32>, vector<2x7xf32> -> vector<2x7xf32>
    %c0_7 = arith.constant 0 : index
    %c0_8 = arith.constant 0 : index
    %9 = vector.load %arg3[%c0_7, %c0_8] : memref<2x64xf32, #tpu.memory_space<vmem>>, vector<2x64xf32>
    %10 = vector.extract_strided_slice %6 {offsets = [32, 0], sizes = [64, 7], strides = [1, 1]} : vector<96x7xf32> to vector<64x7xf32>
    %cst_9 = arith.constant dense<0.000000e+00> : vector<2x7xf32>
    %11 = tpu.matmul %9, %10, %cst_9 {dimension_numbers = #tpu.dot_dimension_numbers<[1], [0], [0], [1], [0, 0, 1, 1], [], []>} : vector<2x64xf32>, vector<64x7xf32>, vector<2x7xf32> -> vector<2x7xf32>
    %12 = arith.addf %8, %11 : vector<2x7xf32>
    %c0_10 = arith.constant 0 : index
    %c0_11 = arith.constant 0 : index
    %13 = vector.load %arg5[%c0_10, %c0_11] : memref<1x7xf32, #tpu.memory_space<vmem>>, vector<1x7xf32>
    %14 = vector.broadcast %13 : vector<1x7xf32> to vector<2x7xf32>
    %15 = arith.addf %12, %14 : vector<2x7xf32>
    %16 = vector.extract_strided_slice %15 {offsets = [0, 0], sizes = [2, 3], strides = [1, 1]} : vector<2x7xf32> to vector<2x3xf32>
    %cst_12 = arith.constant dense<0xFF800000> : vector<2xf32>
    %17 = vector.multi_reduction <maximumf>, %16, %cst_12 [1] : vector<2x3xf32> to vector<2xf32>
    %18 = vector.shape_cast %17 : vector<2xf32> to vector<2x1xf32>
    %19 = vector.broadcast %18 : vector<2x1xf32> to vector<2x3xf32>
    %20 = arith.subf %16, %19 : vector<2x3xf32>
    %21 = math.exp %20 : vector<2x3xf32>
    %cst_13 = arith.constant dense<0.000000e+00> : vector<2xf32>
    %22 = vector.multi_reduction <add>, %21, %cst_13 [1] : vector<2x3xf32> to vector<2xf32>
    %23 = vector.shape_cast %22 : vector<2xf32> to vector<2x1xf32>
    %24 = tpu.reciprocal %23 {approx = true} : vector<2x1xf32> -> vector<2x1xf32>
    %25 = vector.broadcast %24 : vector<2x1xf32> to vector<2x3xf32>
    %26 = arith.mulf %21, %25 : vector<2x3xf32>
    %c0_14 = arith.constant 0 : index
    %c0_15 = arith.constant 0 : index
    %27 = vector.load %arg6[%c0_14, %c0_15] : memref<2x3xf32, #tpu.memory_space<vmem>>, vector<2x3xf32>
    tpu.vector_store %arg6[%c0_14, %c0_15], %26 {strides = array<i32>} : memref<2x3xf32, #tpu.memory_space<vmem>>, vector<2x3xf32>,
    %28 = vector.extract_strided_slice %15 {offsets = [0, 3], sizes = [2, 4], strides = [1, 1]} : vector<2x7xf32> to vector<2x4xf32>
    %cst_16 = arith.constant dense<0xFF800000> : vector<2xf32>
    %29 = vector.multi_reduction <maximumf>, %28, %cst_16 [1] : vector<2x4xf32> to vector<2xf32>
    %30 = vector.shape_cast %29 : vector<2xf32> to vector<2x1xf32>
    %31 = vector.broadcast %30 : vector<2x1xf32> to vector<2x4xf32>
    %32 = arith.subf %28, %31 : vector<2x4xf32>
    %33 = math.exp %32 : vector<2x4xf32>
    %cst_17 = arith.constant dense<0.000000e+00> : vector<2xf32>
    %34 = vector.multi_reduction <add>, %33, %cst_17 [1] : vector<2x4xf32> to vector<2xf32>
    %35 = vector.shape_cast %34 : vector<2xf32> to vector<2x1xf32>
    %36 = tpu.reciprocal %35 {approx = true} : vector<2x1xf32> -> vector<2x1xf32>
    %37 = vector.broadcast %36 : vector<2x1xf32> to vector<2x4xf32>
    %38 = arith.mulf %33, %37 : vector<2x4xf32>
    %c0_18 = arith.constant 0 : index
    %c0_19 = arith.constant 0 : index
    %39 = vector.load %arg7[%c0_18, %c0_19] : memref<2x4xf32, #tpu.memory_space<vmem>>, vector<2x4xf32>
    tpu.vector_store %arg7[%c0_18, %c0_19], %38 {strides = array<i32>} : memref<2x4xf32, #tpu.memory_space<vmem>>, vector<2x4xf32>,
    return
  }
  func.func @transform_0(%arg0: i32) -> (i32, i32, i32) {
    %c0_i32 = arith.constant 0 : i32
    %c0_i32_0 = arith.constant 0 : i32
    %c0_i32_1 = arith.constant 0 : i32
    %c0_i32_2 = arith.constant 0 : i32
    return %c0_i32, %c0_i32_0, %c0_i32_1 : i32, i32, i32
  }
  func.func @transform_1(%arg0: i32) -> (i32, i32) {
    %c0_i32 = arith.constant 0 : i32
    %c0_i32_0 = arith.constant 0 : i32
    %c0_i32_1 = arith.constant 0 : i32
    return %c0_i32, %c0_i32_0 : i32, i32
  }
  func.func @transform_2(%arg0: i32) -> (i32, i32) {
    %c0_i32 = arith.constant 0 : i32
    %c0_i32_0 = arith.constant 0 : i32
    %c0_i32_1 = arith.constant 0 : i32
    return %c0_i32, %c0_i32_0 : i32, i32
  }
  func.func @transform_3(%arg0: i32) -> (i32, i32) {
    %c0_i32 = arith.constant 0 : i32
    %c0_i32_0 = arith.constant 0 : i32
    %c0_i32_1 = arith.constant 0 : i32
    return %c0_i32, %c0_i32_0 : i32, i32
  }
  func.func @transform_4(%arg0: i32) -> (i32, i32) {
    %c0_i32 = arith.constant 0 : i32
    %c0_i32_0 = arith.constant 0 : i32
    %c0_i32_1 = arith.constant 0 : i32
    return %c0_i32, %c0_i32_0 : i32, i32
  }
  func.func @transform_5(%arg0: i32) -> (i32, i32) {
    %c0_i32 = arith.constant 0 : i32
    %c0_i32_0 = arith.constant 0 : i32
    %c0_i32_1 = arith.constant 0 : i32
    return %c0_i32, %c0_i32_0 : i32, i32
  }
  func.func @transform_6(%arg0: i32) -> (i32, i32) {
    %c0_i32 = arith.constant 0 : i32
    %c0_i32_0 = arith.constant 0 : i32
    %c0_i32_1 = arith.constant 0 : i32
    return %c0_i32, %c0_i32_0 : i32, i32
  }
}

</mosaic_0001>

<bundles_post_ra>
// kernel: bert_attribution_forward.3
= control target key start
LH: loop header
LB: loop body
LE: loop exit
PB: predicated region body
PF: predicated region fallthrough
CT: control target
= control target key end

     0   :  { %12 = vsyncpa [#allocation3], 0  ;;  %v27_v0 = vlaneseq  ;;  %v419_v1 = vmov 0.0|0.0   ;;  %s545_s0 = inlined_call_operand.vmem [shape: f32[2,8,32], index: 0, kind: input, shape index: {}]   ;;  %s546_s1 = inlined_call_operand.vmem [shape: f32[2,8], index: 1, kind: input, shape index: {}]   ;;  %s547_s2 = inlined_call_operand.vmem [shape: f32[2,64], index: 2, kind: input, shape index: {}]   ;;  %s548_s3 = inlined_call_operand.vmem [shape: f32[96,7], index: 3, kind: input, shape index: {}]   ;;  %s549_s4 = inlined_call_operand.vmem [shape: f32[1,7], index: 4, kind: input, shape index: {}]   ;;  %s550_s5 = inlined_call_operand.hbm [shape: f32[2,3], index: 5, kind: output, shape index: {0}]   ;;  %s551_s6 = inlined_call_operand.hbm [shape: f32[2,4], index: 6, kind: output, shape index: {1}]  }
   0x1   :  { %339 = vmatprep.subr.bf16.mxu0 %v419_v1  ;;  %v62_v2 = vld [vmem:[%s548_s3 + $0x20] sm:$0xff]  ;;  %v63_v3 = vld [vmem:[%s548_s3 + $0x28] sm:$0xff]  ;;  %v64_v4 = vld [vmem:[%s548_s3 + $0x30] sm:$0xff]  ;;  %351 = vmatprep.subr.bf16.mxu1 %v419_v1 }
   0x2   :  { %v28_v5 = vshrl.u32 %v27_v0, 7  ;;  %v340_v6 = vpack.c.bf16 %v63_v3, %v62_v2  ;;  %v65_v7 = vld [vmem:[%s548_s3 + $0x38] sm:$0xff] }
   0x3   :  { %13 = vsyncpa [#allocation5], 0  ;;  %v26_v8 = vld [vmem:[%s546_s1] sm:$0x3]  ;;  %v343_v11 = vpack.c.bf16 %v65_v7, %v64_v4  ;;  %v67_v13 = vld [vmem:[%s548_s3 + $0x48] sm:$0xff]  ;;  %vm420_vm0 = vmmov 0  }
   0x4   :  { %v29_v9 = vsub.s32 0, %v28_v5  ;;  %v36_v10 = vsub.s32 1, %v28_v5  ;;  %341 = vmatpush3.bf16.msra.mxu0 %v340_v6  ;;  %v66_v12 = vld [vmem:[%s548_s3 + $0x40] sm:$0xff]  ;;  %v59_v15 = vld [vmem:[%s548_s3 + $0x8] sm:$0xff]  ;;  %v68_v20 = vld [vmem:[%s548_s3 + $0x50] sm:$0xff]  ;;  %v421_v26 = vmov 0.0  }
   0x5   :  { %342 = vmatprep.subr.bf16.mxu0 %v419_v1  ;;  %v58_v14 = vld [vmem:[%s548_s3] sm:$0xff]  ;;  %v346_v19 = vpack.c.bf16 %v67_v13, %v66_v12  ;;  %v69_v21 = vld [vmem:[%s548_s3 + $0x58] sm:$0xff]  ;;  %v60_v22 = vld [vmem:[%s548_s3 + $0x10] sm:$0xff]  ;;  %325 = vmatprep.mubr.msk.f32.mxu0 %vm420_vm0, %v421_v26  ;;  %vm71_vm1 = vcmask 523264   ;;  %vm43_vm2 = vcmask 261120   ;;  %vm147_vm3 = vcmask 1041409  }
   0x6   :  { %v30_v16 = vrot.slane %v26_v8, %v29_v9  ;;  %v352_v17 = vpack.c.bf16 %v59_v15, %v58_v14  ;;  %v37_v18 = vrot.slane %v26_v8, %v36_v10  ;;  %v61_v23 = vld [vmem:[%s548_s3 + $0x18] sm:$0xff]  ;;  %v349_v25 = vpack.c.bf16 %v69_v21, %v68_v20  ;;  %336 = vmatprep.mubr.msk.f32.mxu1 %vm420_vm0, %v421_v26  ;;  %v70_v27 = vld [vmem:[%s547_s2] sm:$0x3]  ;;  %v25_v31 = vld [vmem:[%s545_s0 + $0x8] sm:$0xff]  ;;  %s423_s27 = smov [#allocation2]  }
   0x7   :  { %v355_v24 = vpack.c.bf16 %v61_v23, %v60_v22  ;;  %v24_v28 = vld [vmem:[%s545_s0] sm:$0xff]  ;;  %vm242_vm4 = vcmask 50200   ;;  %vm229_vm5 = vcmask 17408   ;;  %vm253_vm6 = vcmask 25600   ;;  %s270_s28 = sshll.u32 %s423_s27, 4  ;;  %s271_s28 = int_to_ptr.vmem [resolvable:$true] %s270_s28 }
   0x8   :  { %32 = vbcast.lane.b32.xlu0 %v30_v16, 256  ;;  %344 = vmatpush3.bf16.msra.mxu0 %v343_v11  ;;  %v294_v52 = vld [vmem:[%s549_s4] ss:$0 sm:$0xff]  ;;  %s422_s4 = smov 125   ;;  %s371_s29 = scalar_lea.vmem %s271_s28, 32 }
   0x9   :  { %345 = vmatprep.subr.bf16.mxu0 %v419_v1  ;;  %353 = vmatpush3.bf16.msra.mxu1 %v352_v17  ;;  %p372_p0 = scmp.ne.s32.totalorder %s271_s28, %s371_s29  ;;  %p376_p1 = scmp.lt.s32.totalorder %s271_s28, %s271_s28 }
   0xa   :  { %354 = vmatprep.subr.bf16.mxu1 %v419_v1  ;;  %p377_p2 = scmp.lt.s32.totalorder %s371_s29, %s371_s29 }
   0xc   :  { %39 = vbcast.lane.b32.xlu0 %v37_v18, 256  ;;  %347 = vmatpush3.bf16.msra.mxu0 %v346_v19  ;;  %p378_p3 = por %p377_p2, %p376_p1 }
   0xd   :  { %348 = vmatprep.subr.bf16.mxu0 %v419_v1  ;;  %356 = vmatpush3.bf16.msra.mxu1 %v355_v24 }
   0xe   :  { %p379_p4 = pnand %p378_p3, %p372_p0 }
  0x10   :  { %350 = vmatpush3.bf16.msra.mxu0 %v349_v25 }
  0x13   :  { %326 = vmatmul.mubr.msk.f32.vlgmr.msra.gmra.mrb[0].mxu0 %vm71_vm1, %v70_v27 }
  0x7a   :  { %v33_v29 = vpop.permute.xlu0 %32 }
  0x7b   :  { %v41_v30 = vadd.f32 %v33_v29, %v24_v28 }
  0x7d   :  { %v44_v32 = vsel %vm43_vm2, %v41_v30, -inf }
  0x7e   :  { %v45_v33 = vrot.slane %v44_v32, 4  ;;  %v40_v34 = vpop.permute.xlu0 %39 }
  0x7f   :  { %v42_v35 = vadd.f32 %v40_v34, %v25_v31 }
  0x80   :  { %v46_v36 = vmax.f32 %v44_v32, %v45_v33 }
  0x81   :  { %v51_v37 = vsel %vm43_vm2, %v42_v35, -inf }
  0x82   :  { %v47_v38 = vrot.slane %v46_v36, 2  ;;  %v52_v39 = vrot.slane %v51_v37, 4 }
  0x84   :  { %v48_v40 = vmax.f32 %v46_v36, %v47_v38  ;;  %v53_v41 = vmax.f32 %v51_v37, %v52_v39 }
  0x86   :  { %v54_v42 = vrot.slane %v53_v41, 2  ;;  %v49_v43 = vrot.slane %v48_v40, 1 }
  0x88   :  { %v55_v44 = vmax.f32 %v53_v41, %v54_v42  ;;  %v50_v46 = vmax.f32 %v48_v40, %v49_v43 }
  0x8a   :  { %v56_v45 = vrot.slane %v55_v44, 1 }
  0x8c   :  { %v57_v47 = vmax.f32 %v55_v44, %v56_v45 }
  0x8e   :  { %v148_v48 = vsel %vm147_vm3, %v57_v47, %v50_v46 }
  0x8f   :  { %337 = vmatmul.mubr.msk.f32.vlgmr.msra.gmra.mrb[0].mxu1 %vm43_vm2, %v148_v48 }
  0xe6   :  { %v141_v49 = vpop.f32.mrb[0].mxu0 }
  0xe7   :  { %v327_v50 = vpop.f32.mrb[1].mxu0 }
 0x162   :  { %v217_v51 = vpop.f32.mrb[0].mxu1 }
 0x163   :  { %v218_v53 = vadd.f32 %v217_v51, %v141_v49  ;;  %v338_v54 = vpop.f32.mrb[1].mxu1 }
 0x165   :  { %v228_v55 = vadd.f32 %v294_v52, %v218_v53 }
 0x167   :  { %v243_v56 = vsel %vm242_vm4, %v228_v55, -inf  ;;  %v230_v57 = vsel %vm229_vm5, %v228_v55, -inf }
 0x168   :  { %244 = vmax.xlane.f32.xlu1 %v243_v56  ;;  %231 = vmax.xlane.f32.xlu0 %v230_v57 }
 0x1f5   :  { %v245_v58 = vpop.xlane.xlu1 %244  ;;  %v232_v59 = vpop.xlane.xlu0 %231 }
 0x1f6   :  { %v246_v60 = vsub.f32 %v228_v55, %v245_v58  ;;  %v233_v61 = vsub.f32 %v228_v55, %v232_v59 }
 0x1f8   :  { %v247_v62 = vmul.f32 1.442695, %v246_v60  ;;  %v234_v63 = vmul.f32 1.442695, %v233_v61 }
 0x1fa   :  { %363 = vpow2.f32 %v247_v62 }
 0x1fb   :  { %365 = vpow2.f32 %v234_v63 }
 0x204   :  { %v364_v0 = vpop.eup %363 }
 0x205   :  { %v366_v1 = vpop.eup %365  ;;  %250 = vrot.lane.b32.xlu1 %v364_v0, %s422_s4 }
 0x206   :  { %v236_v2 = vsel %vm229_vm5, %v366_v1, 0.0 }
 0x207   :  { %237 = vadd.xlane.f32.xlu0 %v236_v2 }
 0x277   :  { %v251_v3 = vpop.permute.xlu1 %250 }
 0x278   :  { %v254_v4 = vsel %vm253_vm6, %v251_v3, 0.0 }
 0x279   :  { %255 = vadd.xlane.f32.xlu1 %v254_v4 }
 0x294   :  { %v238_v5 = vpop.xlane.xlu0 %237 }
 0x295   :  { %367 = vrcp.f32 %v238_v5 }
 0x29f   :  { %v368_v6 = vpop.eup %367 }
 0x2a0   :  { %v240_v7 = vmul.f32 %v368_v6, %v366_v1 }
 0x2a2   :  { %241 = vst.msk [vmem:[#allocation2] sm:$0x3] %vm229_vm5, %v240_v7 }
 0x306   :  { %v256_v8 = vpop.xlane.xlu1 %255 }
 0x307   :  { %369 = vrcp.f32 %v256_v8 }
 0x308   :  { %382 = shalt.err (!%p379_p4)
}
 0x309   :  { %s383_s8 = scalar_lea.hbm %s550_s5, 32 }
 0x30a   :  { %p384_p5 = scmp.ne.s32.totalorder %s550_s5, %s383_s8  ;;  %p387_p6 = scmp.lt.u32.totalorder %s383_s8, %s550_s5 }
 0x30c   :  { %p389_p7 = pnand %p387_p6, %p384_p5 }
 0x30e   :  { %392 = shalt.err (!%p389_p7)
}
 0x30f   :  { %273 = dma.vmem_to_hbm [thread:$0]  %s271_s28, 32, %s550_s5, [#allocation3]  }
 0x310   :  { %s424_s1 = smov [#allocation4]  }
 0x311   :  { %v370_v9 = vpop.eup %369  ;;  %s280_s15 = sshll.u32 %s424_s1, 4  ;;  %s281_s15 = int_to_ptr.vmem [resolvable:$true] %s280_s15 }
 0x312   :  { %v258_v10 = vmul.f32 %v370_v9, %v364_v0  ;;  %s393_s16 = scalar_lea.vmem %s281_s15, 32  ;;  %p398_p9 = scmp.lt.s32.totalorder %s281_s15, %s281_s15 }
 0x313   :  { %p394_p8 = scmp.ne.s32.totalorder %s281_s15, %s393_s16  ;;  %p399_p10 = scmp.lt.s32.totalorder %s393_s16, %s393_s16 }
 0x314   :  { %260 = vrot.lane.b32.xlu0 %v258_v10, %s422_s4 }
 0x315   :  { %p400_p11 = por %p399_p10, %p398_p9 }
 0x317   :  { %p401_p12 = pnand %p400_p11, %p394_p8 }
 0x386   :  { %v261_v11 = vpop.permute.xlu0 %260 }
 0x387   :  { %263 = vst.msk [vmem:[#allocation4] sm:$0x3] %vm253_vm6, %v261_v11 }
 0x388   :  { %404 = shalt.err (!%p401_p12)
}
 0x389   :  { %s405_s5 = scalar_lea.hbm %s551_s6, 32 }
 0x38a   :  { %p406_p13 = scmp.ne.s32.totalorder %s551_s6, %s405_s5  ;;  %p409_p0 = scmp.lt.u32.totalorder %s405_s5, %s551_s6 }
 0x38c   :  { %p411_p1 = pnand %p409_p0, %p406_p13 }
 0x38e   :  { %414 = shalt.err (!%p411_p1)
}
 0x38f   :  { %283 = dma.vmem_to_hbm [thread:$0]  %s281_s15, 32, %s551_s6, [#allocation5]  }
 0x390   :  { %415 = dma.done.wait [#allocation3], 32  }
 0x391   :  { %416 = vsyncadd [#allocation3], 4294967264 }
 0x392   :  { %417 = dma.done.wait [#allocation5], 32  }
 0x393   :  { %418 = vsyncadd [#allocation5], 4294967264 }
 0x394   :  { %290 = vsyncpa [#allocation3], 1 }
 0x395   :  { %291 = vsyncpa [#allocation5], 1 }

// kernel: bert_attribution_forward.2
= control target key start
LH: loop header
LB: loop body
LE: loop exit
PB: predicated region body
PF: predicated region fallthrough
CT: control target
= control target key end

     0   :  { %s2781_s21 = smov 0   ;;  %s3112_s0 = inlined_call_operand.vmem [shape: f32[2,8,32], index: 0, kind: input, shape index: {}]   ;;  %s3113_s1 = inlined_call_operand.vmem [shape: f32[2,1,8], index: 1, kind: input, shape index: {}]   ;;  %s3114_s2 = inlined_call_operand.vmem [shape: f32[1,32], index: 2, kind: input, shape index: {}]   ;;  %s3115_s3 = inlined_call_operand.vmem [shape: f32[1,32], index: 3, kind: input, shape index: {}]   ;;  %s3116_s4 = inlined_call_operand.vmem [shape: f32[2,32,96], index: 4, kind: input, shape index: {}]   ;;  %s3117_s5 = inlined_call_operand.vmem [shape: f32[2,1,96], index: 5, kind: input, shape index: {}]   ;;  %s3118_s6 = inlined_call_operand.vmem [shape: f32[2,32,32], index: 6, kind: input, shape index: {}]   ;;  %s3119_s7 = inlined_call_operand.vmem [shape: f32[2,1,32], index: 7, kind: input, shape index: {}]   ;;  %s3120_s8 = inlined_call_operand.vmem [shape: f32[2,1,32], index: 8, kind: input, shape index: {}]   ;;  %s3121_s9 = inlined_call_operand.vmem [shape: f32[2,1,32], index: 9, kind: input, shape index: {}]   ;;  %s3122_s10 = inlined_call_operand.vmem [shape: f32[2,32,64], index: 10, kind: input, shape index: {}]   ;;  %s3123_s11 = inlined_call_operand.vmem [shape: f32[2,1,64], index: 11, kind: input, shape index: {}]   ;;  %s3124_s12 = inlined_call_operand.vmem [shape: f32[2,64,32], index: 12, kind: input, shape index: {}]   ;;  %s3125_s13 = inlined_call_operand.vmem [shape: f32[2,1,32], index: 13, kind: input, shape index: {}]   ;;  %s3126_s14 = inlined_call_operand.vmem [shape: f32[2,1,32], index: 14, kind: input, shape index: {}]   ;;  %s3127_s15 = inlined_call_operand.vmem [shape: f32[2,1,32], index: 15, kind: input, shape index: {}]   ;;  %s3128_s16 = inlined_call_operand.vmem [shape: f32[2,8,32], index: 16, kind: output, shape index: {}]  }
   0x1   :  { %3131 = sst [smem:[#allocation2_spill]] %s3112_s0 }
   0x2 LB: > { %s2280_s22 = sadd.s32 4294967295, %s2686_s21   ;;  %p2284_p0 = scmp.ge.s32.totalorder %s2686_s21, 1  ;;  %s2686_s21 = sphi %s2781_s21, %s26_s21  }
   0x3   : > { %p469_p1 = scmp.lt.s32.totalorder %s2686_s21, 3 }
   0x5   : > { %p470_p2 = pnand %p2284_p0, %p469_p1 }
   0x6   : > { %p520_p3 = scmp.lt.s32.totalorder (!%p470_p2), %s2280_s22, 1  ;;  %vm535_vm0 = vcmask (!%p470_p2), 261120   ;;  %s3132_s26 = sld [smem:[#allocation2_spill]] (!%p470_p2)  ;;  %v564_v7 = vld [vmem:[%s3116_s4] sm:$0xff] (!%p470_p2)  ;;  %v565_v8 = vld [vmem:[%s3116_s4 + $0x8] sm:$0xff] (!%p470_p2)  ;;  %v566_v9 = vld [vmem:[%s3116_s4 + $0x10] sm:$0xff] (!%p470_p2) }
   0x7   : > { %473 = sbr.rel (%p470_p2) target bundleno = 5086 (0x13de), region = 84  ;;  %v2688_v10 = vmov (!%p470_p2), 0.0|0.0   ;;  %v2575_v11 = vpack.c.bf16 (!%p470_p2), %v565_v8, %v564_v7  ;;  %v567_v12 = vld [vmem:[%s3116_s4 + $0x18] sm:$0xff] (!%p470_p2)  ;;  %vm2689_vm1 = vmmov (!%p470_p2), 0   ;;  %v2690_v13 = vmov (!%p470_p2), 0.0   ;;  %s2691_s30 = smov (!%p470_p2), 112  }
   0x8   : > { %2574 = vmatprep.subr.bf16.mxu0 (!%p470_p2), %v2688_v10  ;;  %2432 = vmatprep.mubr.msk.f32.mxu0 (!%p470_p2), %vm2689_vm1, %v2690_v13  ;;  %v2578_v14 = vpack.c.bf16 (!%p470_p2), %v567_v12, %v566_v9  ;;  %v2287_v19 = vld [vmem:[%s3114_s2] ss:$0 sm:$0xff] (!%p470_p2)  ;;  %s2692_s0 = smov (!%p470_p2), 96   ;;  %s2693_s17 = smov (!%p470_p2), 80   ;;  %vm655_vm2 = vcmask (!%p470_p2), 130048   ;;  %vm738_vm3 = vcmask (!%p470_p2), 64512  }
   0x9   : > { %2440 = vmatprep.subr.mxu1 (!%p470_p2), %v2690_v13  ;;  %2442 = vmatprep.mubr.msk.f32.mxu1 (!%p470_p2), %vm2689_vm1, %v2690_v13  ;;  %v2288_v21 = vld [vmem:[%s3115_s3] ss:$0 sm:$0xff] (!%p470_p2)  ;;  %s2694_s24 = smov (!%p470_p2), 48   ;;  %s3130_s25 = smov (!%p470_p2), 64   ;;  %v649_v58 = vld [vmem:[%s3118_s6 + $0x8] sm:$0xff] (!%p470_p2)  ;;  %v650_v63 = vld [vmem:[%s3118_s6 + $0x10] sm:$0xff] (!%p470_p2) }
   0xa   : > { %2576 = vmatpush3.bf16.msra.mxu0 (!%p470_p2), %v2575_v11  ;;  %v2289_v24 = vld [vmem:[%s3117_s5] ss:$0 sm:$0xff] (!%p470_p2)  ;;  %vm1285_vm4 = vcmask (!%p470_p2), 523264  }
   0xb   : > { %2577 = vmatprep.subr.bf16.mxu0 (!%p470_p2), %v2688_v10  ;;  %v648_v57 = vld [vmem:[%s3118_s6] sm:$0xff] (!%p470_p2) }
   0xc   : > { %v2584_v61 = vpack.c.bf16 (!%p470_p2), %v649_v58, %v648_v57  ;;  %v2300_v9 = vld [vmem:[%s3119_s7] ss:$0 sm:$0xff] (!%p470_p2) }
   0xe   : > { %s3136_s22 = smov (!%p520_p3, %s2280_s22), 1  ;;  %2579 = vmatpush3.bf16.msra.mxu0 %v2578_v14 }
   0xf   : > { %s3129_s23 = sshll.u32 %s3136_s22, 3  ;;  %2435 = vmatprep.subr.mxu0 %v2690_v13  ;;  %s526_s20 = scalar_lea.vmem %s3113_s1, %s3136_s22 }
  0x10   : > { %s523_s27 = scalar_lea.vmem %s3132_s26, %s3129_s23  ;;  %v2851_v31 = vld [vmem:[%s526_s20] ss:$0 sm:$0xff] }
  0x11   : > { %v531_v0 = vld [vmem:[%s523_s27] sm:$0xff]  ;;  %s3134_s27 = sshll.u32 %s3136_s22, 3 }
  0x12   : > { %v536_v1 = vsel %vm535_vm0, %v531_v0, 0.0  ;;  %s530_s18 = scalar_lea.vmem %s3128_s16, %s3134_s27 }
  0x13   : > { %537 = vadd.xlane.f32.xlu0 %v536_v1 }
  0xa0   : > { %v538_v2 = vpop.xlane.xlu0 %537 }
  0xa1   : > { %v540_v3 = vmul.f32 0.03125, %v538_v2 }
  0xa3   : > { %v541_v4 = vsub.f32 %v531_v0, %v540_v3  ;;  %v651_v0 = vld [vmem:[%s3118_s6 + $0x18] sm:$0xff] }
  0xa4   : > { %v2581_v1 = vpack.c.bf16 %v651_v0, %v650_v63  ;;  %v2305_v63 = vld [vmem:[%s3125_s13] ss:$0 sm:$0xff] }
  0xa5   : > { %v542_v5 = vmul.f32 %v541_v4, %v541_v4 }
  0xa7   : > { %v543_v6 = vsel %vm535_vm0, %v542_v5, 0.0 }
  0xa8   : > { %544 = vadd.xlane.f32.xlu0 %v543_v6 }
 0x135   : > { %v545_v15 = vpop.xlane.xlu0 %544 }
 0x136   : > { %v546_v16 = vmul.f32 0.03125, %v545_v15 }
 0x138   : > { %v547_v17 = vadd.f32 1e-12, %v546_v16 }
 0x13a   : > { %2650 = vrsqrt.f32 %v547_v17 }
 0x144   : > { %v2651_v18 = vpop.eup %2650 }
 0x145   : > { %v549_v20 = vmul.f32 %v2651_v18, %v541_v4 }
 0x147   : > { %v556_v22 = vmul.f32 %v2287_v19, %v549_v20 }
 0x149   : > { %v2825_v23 = vadd.f32 %v2288_v21, %v556_v22  ;;  %v1177_v22 = vld [vmem:[%s3122_s10] sm:$0xff] }
 0x14b   : > { %2433 = vmatmul.mubr.msk.f32.vlgmr.msra.gmra.mrb[0].mxu0 %vm535_vm0, %v2825_v23 }
 0x14c   : > { %2437 = vmatprep.mubr.msk.f32.mxu0 %vm2689_vm1, %v2690_v13 }
 0x21e   : > { %v644_v25 = vpop.f32.mrb[0].mxu0 }
 0x21f   : > { %v645_v26 = vadd.f32 %v2289_v24, %v644_v25  ;;  %v2434_v27 = vpop.f32.mrb[1].mxu0  ;;  %v1178_v24 = vld [vmem:[%s3122_s10 + $0x8] sm:$0xff] }
 0x220   : > { %v2587_v25 = vpack.c.bf16 %v1178_v24, %v1177_v22  ;;  %v2307_v22 = vld [vmem:[%s3126_s14] ss:$0 sm:$0xff] }
 0x221   : > { %826 = vrot.lane.b32.xlu0 %v645_v26, %s2691_s30  ;;  %653 = vrot.lane.b32.xlu1 %v645_v26, %s2692_s0 }
 0x225   : > { %828 = vrot.lane.b32.xlu1 %v645_v26, %s2693_s17 }
 0x293   : > { %v654_v28 = vpop.permute.xlu1 %653  ;;  %v827_v30 = vpop.permute.xlu0 %826 }
 0x294   : > { %2436 = vmatpush3.xpose.msk.msra.mxu0 %vm655_vm2, %v654_v28 }
 0x295   : > { %2445 = vmatprep.subr.mxu0 %v2690_v13 }
 0x297   : > { %2438 = vmatmul.mubr.msk.f32.vlgmr.msra.gmra.mrb[2].mxu0 %vm655_vm2, %v645_v26  ;;  %v829_v29 = vpop.permute.xlu1 %828 }
 0x298   : > { %2446 = vmatpush3.xpose.msk.msra.mxu0 %vm655_vm2, %v829_v29  ;;  %2447 = vmatprep.mubr.msk.f32.mxu0 %vm2689_vm1, %v2690_v13 }
 0x299   : > { %2580 = vmatprep.subr.bf16.mxu0 %v2688_v10 }
 0x29b   : > { %2448 = vmatmul.mubr.msk.f32.vlgmr.msra.gmra.mrb[4].mxu0 %vm655_vm2, %v827_v30 }
 0x29c   : > { %2459 = vmatprep.mubr.msk.f32.mxu0 %vm2689_vm1, %v2690_v13  ;;  %2582 = vmatpush3.bf16.msra.mxu0 %v2581_v1 }
 0x29d   : > { %2586 = vmatprep.subr.bf16.mxu0 %v2688_v10 }
 0x36a   : > { %v726_v32 = vpop.f32.mrb[2].mxu0 }
 0x36b   : > { %v730_v33 = vmul.f32 0.25, %v726_v32  ;;  %v2439_v34 = vpop.f32.mrb[3].mxu0 }
 0x36d   : > { %v737_v35 = vadd.f32 %v2851_v31, %v730_v33  ;;  %v2301_v33 = vld [vmem:[%s3120_s8] ss:$0 sm:$0xff] }
 0x36e   : > { %v900_v36 = vpop.f32.mrb[4].mxu0 }
 0x36f   : > { %v904_v37 = vmul.f32 0.25, %v900_v36  ;;  %v2449_v38 = vpop.f32.mrb[5].mxu0  ;;  %v739_v39 = vsel %vm738_vm3, %v737_v35, -inf }
 0x370   : > { %740 = vmax.xlane.f32.xlu1 %v739_v39  ;;  %v1270_v38 = vld [vmem:[%s3124_s12] sm:$0xff]  ;;  %v1271_v39 = vld [vmem:[%s3124_s12 + $0x8] sm:$0xff] }
 0x371   : > { %v905_v40 = vadd.f32 %v2851_v31, %v904_v37 }
 0x373   : > { %v906_v41 = vsel %vm738_vm3, %v905_v40, -inf }
 0x374   : > { %907 = vmax.xlane.f32.xlu0 %v906_v41  ;;  %v1272_v41 = vld [vmem:[%s3124_s12 + $0x10] sm:$0xff] }
 0x38a   : > { %917 = vrot.lane.b32.xlu0 %v645_v26, %s2694_s24 }
 0x3fd   : > { %v741_v42 = vpop.xlane.xlu1 %740 }
 0x3fe   : > { %v742_v43 = vsub.f32 %v737_v35, %v741_v42  ;;  %v2302_v35 = vld [vmem:[%s3121_s9] ss:$0 sm:$0xff]  ;;  %v1273_v42 = vld [vmem:[%s3124_s12 + $0x18] sm:$0xff] }
 0x400   : > { %v743_v44 = vmul.f32 1.442695, %v742_v43  ;;  %v2596_v43 = vpack.c.bf16 %v1273_v42, %v1272_v41 }
 0x401   : > { %v908_v45 = vpop.xlane.xlu0 %907 }
 0x402   : > { %2652 = vpow2.f32 %v743_v44  ;;  %v909_v46 = vsub.f32 %v905_v40, %v908_v45  ;;  %v2593_v40 = vpack.c.bf16 %v1271_v39, %v1270_v38  ;;  %v1274_v44 = vld [vmem:[%s3124_s12 + $0x20] sm:$0xff]  ;;  %v1275_v45 = vld [vmem:[%s3124_s12 + $0x28] sm:$0xff] }
 0x404   : > { %v910_v47 = vmul.f32 1.442695, %v909_v46  ;;  %v2599_v46 = vpack.c.bf16 %v1275_v45, %v1274_v44 }
 0x405   : > { %v918_v59 = vpop.permute.xlu0 %917 }
 0x406   : > { %2654 = vpow2.f32 %v910_v47  ;;  %v1276_v47 = vld [vmem:[%s3124_s12 + $0x30] sm:$0xff] }
 0x40c   : > { %v2653_v48 = vpop.eup %2652 }
 0x40d   : > { %v745_v49 = vsel %vm738_vm3, %v2653_v48, 0.0 }
 0x40e   : > { %746 = vadd.xlane.f32.xlu1 %v745_v49 }
 0x410   : > { %v2655_v50 = vpop.eup %2654 }
 0x411   : > { %v912_v51 = vsel %vm738_vm3, %v2655_v50, 0.0 }
 0x412   : > { %913 = vadd.xlane.f32.xlu1 %v912_v51 }
 0x423   : > { %750 = vrot.lane.b32.xlu1 %v645_v26, %s3130_s25  ;;  %v1180_v26 = vld [vmem:[%s3122_s10 + $0x18] sm:$0xff] }
 0x49b   : > { %v747_v52 = vpop.xlane.xlu1 %746 }
 0x49c   : > { %2656 = vrcp.f32 %v747_v52 }
 0x49f   : > { %v914_v53 = vpop.xlane.xlu1 %913 }
 0x4a0   : > { %2658 = vrcp.f32 %v914_v53 }
 0x4a3   : > { %v751_v54 = vpop.permute.xlu1 %750 }
 0x4a4   : > { %2441 = vmatpush3.msra.mxu1 %v751_v54 }
 0x4a5   : > { %2450 = vmatprep.subr.mxu1 %v2690_v13 }
 0x4a6   : > { %v2657_v55 = vpop.eup %2656 }
 0x4a7   : > { %v749_v56 = vmul.f32 %v2657_v55, %v2653_v48  ;;  %v1277_v48 = vld [vmem:[%s3124_s12 + $0x38] sm:$0xff] }
 0x4a8   : > { %v2602_v49 = vpack.c.bf16 %v1277_v48, %v1276_v47 }
 0x4a9   : > { %2443 = vmatmul.mubr.msk.f32.vlgmr.msra.gmra.mrb[0].mxu1 %vm738_vm3, %v749_v56 }
 0x4aa   : > { %v2659_v60 = vpop.eup %2658  ;;  %2451 = vmatpush3.msra.mxu1 %v918_v59  ;;  %2452 = vmatprep.mubr.msk.f32.mxu1 %vm2689_vm1, %v2690_v13 }
 0x4ab   : > { %v916_v62 = vmul.f32 %v2659_v60, %v2655_v50  ;;  %2583 = vmatprep.subr.bf16.mxu1 %v2688_v10  ;;  %v2303_v50 = vld [vmem:[%s3123_s11] ss:$0 sm:$0xff] }
 0x4ad   : > { %2453 = vmatmul.mubr.msk.f32.vlgmr.msra.gmra.mrb[2].mxu1 %vm738_vm3, %v916_v62 }
 0x4ae   : > { %2585 = vmatpush3.bf16.msra.mxu1 %v2584_v61  ;;  %2466 = vmatprep.mubr.msk.f32.mxu1 %vm2689_vm1, %v2690_v13 }
 0x4af   : > { %2592 = vmatprep.subr.bf16.mxu1 %v2688_v10 }
 0x57c   : > { %v822_v2 = vpop.f32.mrb[0].mxu1 }
 0x57d   : > { %v2444_v3 = vpop.f32.mrb[1].mxu1  ;;  %2467 = vmatmul.mubr.msk.f32.vlgmr.msra.gmra.mrb[4].mxu1 %vm655_vm2, %v822_v2 }
 0x57e   : > { %2496 = vmatprep.mubr.msk.f32.mxu1 %vm2689_vm1, %v2690_v13  ;;  %2594 = vmatpush3.bf16.msra.mxu1 %v2593_v40 }
 0x57f   : > { %2595 = vmatprep.subr.bf16.mxu1 %v2688_v10 }
 0x580   : > { %v989_v4 = vpop.f32.mrb[2].mxu1 }
 0x581   : > { %v2454_v5 = vpop.f32.mrb[3].mxu1  ;;  %2460 = vmatmul.mubr.msk.f32.vlgmr.msra.gmra.mrb[6].mxu0 %vm655_vm2, %v989_v4 }
 0x582   : > { %2477 = vmatprep.mubr.msk.f32.mxu0 %vm2689_vm1, %v2690_v13  ;;  %2588 = vmatpush3.bf16.msra.mxu0 %v2587_v25  ;;  %v2308_v25 = vld [vmem:[%s3127_s15] ss:$0 sm:$0xff] }
 0x583   : > { %2589 = vmatprep.subr.bf16.mxu0 %v2688_v10  ;;  %2597 = vmatpush3.bf16.msra.mxu1 %v2596_v43 }
 0x584   : > { %2598 = vmatprep.subr.bf16.mxu1 %v2688_v10 }
 0x587   : > { %2600 = vmatpush3.bf16.msra.mxu1 %v2599_v46 }
 0x588   : > { %2601 = vmatprep.subr.bf16.mxu1 %v2688_v10 }
 0x58b   : > { %2603 = vmatpush3.bf16.msra.mxu1 %v2602_v49 }
 0x58c   : > { %2515 = vmatprep.subr.mxu1 %v2690_v13 }
 0x650   : > { %v1135_v6 = vpop.f32.mrb[4].mxu1 }
 0x651   : > { %v2468_v7 = vpop.f32.mrb[5].mxu1 }
 0x654   : > { %v1062_v8 = vpop.f32.mrb[6].mxu0 }
 0x655   : > { %v1136_v11 = vadd.f32 %v1135_v6, %v1062_v8  ;;  %v2461_v12 = vpop.f32.mrb[7].mxu0 }
 0x656   : > { %v2310_v12 = vld [vmem:[%s3116_s4 + $0x28] sm:$0xff] }
 0x657   : > { %v1146_v14 = vadd.f32 %v2300_v9, %v1136_v11  ;;  %v2309_v11 = vld [vmem:[%s3116_s4 + $0x20] sm:$0xff] }
 0x659   : > { %v1147_v15 = vadd.f32 %v1146_v14, %v2825_v23  ;;  %v1179_v23 = vld [vmem:[%s3122_s10 + $0x10] sm:$0xff]  ;;  %v2605_v14 = vpack.c.bf16 %v2310_v12, %v2309_v11  ;;  %v2329_v12 = vld [vmem:[%s3119_s7 + $0x1] ss:$0 sm:$0xff] }
 0x65a   : > { %v2590_v27 = vpack.c.bf16 %v1180_v26, %v1179_v23 }
 0x65b   : > { %v1150_v16 = vsel %vm535_vm0, %v1147_v15, 0.0 }
 0x65c   : > { %1151 = vadd.xlane.f32.xlu1 %v1150_v16  ;;  %2591 = vmatpush3.bf16.msra.mxu0 %v2590_v27  ;;  %v2312_v16 = vld [vmem:[%s3116_s4 + $0x38] sm:$0xff]  ;;  %v2314_v27 = vld [vmem:[%s3117_s5 + $0x1] ss:$0 sm:$0xff] }
 0x65d   : > { %2604 = vmatprep.subr.bf16.mxu0 %v2688_v10 }
 0x6e9   : > { %v1152_v17 = vpop.xlane.xlu1 %1151 }
 0x6ea   : > { %v1153_v18 = vmul.f32 0.03125, %v1152_v17 }
 0x6ec   : > { %v1154_v19 = vsub.f32 %v1147_v15, %v1153_v18  ;;  %v2311_v15 = vld [vmem:[%s3116_s4 + $0x30] sm:$0xff] }
 0x6ed   : > { %v2608_v17 = vpack.c.bf16 %v2312_v16, %v2311_v15 }
 0x6ee   : > { %v1155_v20 = vmul.f32 %v1154_v19, %v1154_v19 }
 0x6f0   : > { %v1156_v21 = vsel %vm535_vm0, %v1155_v20, 0.0 }
 0x6f1   : > { %1157 = vadd.xlane.f32.xlu0 %v1156_v21 }
 0x77e   : > { %v1158_v28 = vpop.xlane.xlu0 %1157 }
 0x77f   : > { %v1159_v29 = vmul.f32 0.03125, %v1158_v28 }
 0x781   : > { %v1160_v30 = vadd.f32 1e-12, %v1159_v29 }
 0x783   : > { %2660 = vrsqrt.f32 %v1160_v30 }
 0x78d   : > { %v2661_v32 = vpop.eup %2660 }
 0x78e   : > { %v1162_v34 = vmul.f32 %v2661_v32, %v1154_v19 }
 0x790   : > { %v1169_v36 = vmul.f32 %v2301_v33, %v1162_v34 }
 0x792   : > { %v1176_v37 = vadd.f32 %v2302_v35, %v1169_v36 }
 0x794   : > { %2478 = vmatmul.mubr.msk.f32.vlgmr.msra.gmra.mrb[8].mxu0 %vm535_vm0, %v1176_v37 }
 0x795   : > { %2507 = vmatprep.mubr.msk.f32.mxu0 %vm2689_vm1, %v2690_v13  ;;  %2606 = vmatpush3.bf16.msra.mxu0 %v2605_v14 }
 0x796   : > { %2607 = vmatprep.subr.bf16.mxu0 %v2688_v10 }
 0x799   : > { %2609 = vmatpush3.bf16.msra.mxu0 %v2608_v17 }
 0x79a   : > { %2510 = vmatprep.subr.mxu0 %v2690_v13 }
 0x867   : > { %v1257_v51 = vpop.f32.mrb[8].mxu0 }
 0x868   : > { %v1258_v52 = vadd.f32 %v2303_v50, %v1257_v51  ;;  %v2479_v53 = vpop.f32.mrb[9].mxu0 }
 0x86a   : > { %v1262_v54 = vmul.f32 0.044715, %v1258_v52  ;;  %v1261_v60 = vmul.f32 0.5, %v1258_v52 }
 0x86c   : > { %v1263_v55 = vmul.f32 %v1262_v54, %v1258_v52 }
 0x86e   : > { %v1264_v56 = vmul.f32 %v1263_v55, %v1258_v52 }
 0x870   : > { %v1265_v57 = vadd.f32 %v1264_v56, %v1258_v52 }
 0x872   : > { %v1266_v58 = vmul.f32 0.7978846, %v1265_v57 }
 0x874   : > { %2662 = vtanh.f32 %v1266_v58 }
 0x87e   : > { %v2663_v59 = vpop.eup %2662 }
 0x87f   : > { %v1268_v61 = vadd.f32 1.0, %v2663_v59  ;;  %v2316_v59 = vld [vmem:[%s3118_s6 + $0x20] sm:$0xff] }
 0x881   : > { %v1269_v62 = vmul.f32 %v1268_v61, %v1261_v60  ;;  %v2317_v60 = vld [vmem:[%s3118_s6 + $0x28] sm:$0xff] }
 0x883   : > { %2497 = vmatmul.mubr.msk.f32.vlgmr.msra.gmra.mrb[6].mxu1 %vm1285_vm4, %v1269_v62 }
 0x884   : > { %2517 = vmatprep.mubr.msk.f32.mxu1 %vm2689_vm1, %v2690_v13 }
 0x956   : > { %v1355_v0 = vpop.f32.mrb[6].mxu1 }
 0x957   : > { %v1356_v1 = vadd.f32 %v2305_v63, %v1355_v0  ;;  %v2498_v2 = vpop.f32.mrb[7].mxu1  ;;  %v2614_v63 = vpack.c.bf16 %v2317_v60, %v2316_v59 }
 0x958   : > { %v2319_v2 = vld [vmem:[%s3118_s6 + $0x38] sm:$0xff] }
 0x959   : > { %v1359_v3 = vadd.f32 %v1356_v1, %v1176_v37  ;;  %v2318_v1 = vld [vmem:[%s3118_s6 + $0x30] sm:$0xff] }
 0x95b   : > { %v1362_v4 = vsel %vm535_vm0, %v1359_v3, 0.0 }
 0x95c   : > { %1363 = vadd.xlane.f32.xlu1 %v1362_v4 }
 0x9e9   : > { %v1364_v5 = vpop.xlane.xlu1 %1363 }
 0x9ea   : > { %v1365_v6 = vmul.f32 0.03125, %v1364_v5 }
 0x9ec   : > { %v1366_v7 = vsub.f32 %v1359_v3, %v1365_v6  ;;  %v2611_v3 = vpack.c.bf16 %v2319_v2, %v2318_v1 }
 0x9ee   : > { %v1367_v8 = vmul.f32 %v1366_v7, %v1366_v7 }
 0x9f0   : > { %v1368_v9 = vsel %vm535_vm0, %v1367_v8, 0.0 }
 0x9f1   : > { %1369 = vadd.xlane.f32.xlu1 %v1368_v9 }
 0xa7e   : > { %v1370_v18 = vpop.xlane.xlu1 %1369 }
 0xa7f   : > { %v1371_v19 = vmul.f32 0.03125, %v1370_v18 }
 0xa81   : > { %v1372_v20 = vadd.f32 1e-12, %v1371_v19 }
 0xa83   : > { %2664 = vrsqrt.f32 %v1372_v20 }
 0xa8d   : > { %v2665_v21 = vpop.eup %2664 }
 0xa8e   : > { %v1374_v24 = vmul.f32 %v2665_v21, %v1366_v7 }
 0xa90   : > { %v1381_v23 = vmul.f32 %v2307_v22, %v1374_v24  ;;  %v2334_v24 = vld [vmem:[%s3122_s10 + $0x20] sm:$0xff] }
 0xa92   : > { %v2977_v26 = vadd.f32 %v2308_v25, %v1381_v23  ;;  %v2335_v25 = vld [vmem:[%s3122_s10 + $0x28] sm:$0xff] }
 0xa93   : > { %v2617_v23 = vpack.c.bf16 %v2335_v25, %v2334_v24 }
 0xa94   : > { %2508 = vmatmul.mubr.msk.f32.vlgmr.msra.gmra.mrb[10].mxu0 %vm535_vm0, %v2977_v26 }
 0xa95   : > { %2512 = vmatprep.mubr.msk.f32.mxu0 %vm2689_vm1, %v2690_v13 }
 0xb67   : > { %v1471_v28 = vpop.f32.mrb[10].mxu0 }
 0xb68   : > { %v1472_v29 = vadd.f32 %v2314_v27, %v1471_v28  ;;  %v2509_v30 = vpop.f32.mrb[11].mxu0  ;;  %v2337_v27 = vld [vmem:[%s3122_s10 + $0x38] sm:$0xff] }
 0xb6a   : > { %1648 = vrot.lane.b32.xlu0 %v1472_v29, %s2693_s17  ;;  %1481 = vrot.lane.b32.xlu1 %v1472_v29, %s2692_s0 }
 0xb6e   : > { %1646 = vrot.lane.b32.xlu1 %v1472_v29, %s2691_s30  ;;  %s3133_s30 = smov 64  }
 0xbdc   : > { %v1482_v32 = vpop.permute.xlu1 %1481  ;;  %v1649_v33 = vpop.permute.xlu0 %1648 }
 0xbdd   : > { %2511 = vmatpush3.xpose.msk.msra.mxu0 %vm655_vm2, %v1482_v32 }
 0xbde   : > { %2520 = vmatprep.subr.mxu0 %v2690_v13 }
 0xbe0   : > { %2513 = vmatmul.mubr.msk.f32.vlgmr.msra.gmra.mrb[12].mxu0 %vm655_vm2, %v1472_v29  ;;  %v1647_v34 = vpop.permute.xlu1 %1646 }
 0xbe1   : > { %2521 = vmatpush3.xpose.msk.msra.mxu0 %vm655_vm2, %v1649_v33  ;;  %2522 = vmatprep.mubr.msk.f32.mxu0 %vm2689_vm1, %v2690_v13 }
 0xbe2   : > { %2610 = vmatprep.subr.bf16.mxu0 %v2688_v10 }
 0xbe4   : > { %2523 = vmatmul.mubr.msk.f32.vlgmr.msra.gmra.mrb[14].mxu0 %vm655_vm2, %v1647_v34  ;;  %v2332_v34 = vld [vmem:[%s3120_s8 + $0x1] ss:$0 sm:$0xff] }
 0xbe5   : > { %2534 = vmatprep.mubr.msk.f32.mxu0 %vm2689_vm1, %v2690_v13  ;;  %2612 = vmatpush3.bf16.msra.mxu0 %v2611_v3 }
 0xbe6   : > { %2616 = vmatprep.subr.bf16.mxu0 %v2688_v10 }
 0xcb3   : > { %v1553_v35 = vpop.f32.mrb[12].mxu0 }
 0xcb4   : > { %v1557_v36 = vmul.f32 0.25, %v1553_v35  ;;  %v2514_v37 = vpop.f32.mrb[13].mxu0 }
 0xcb6   : > { %v1558_v38 = vadd.f32 %v2851_v31, %v1557_v36  ;;  %v2333_v36 = vld [vmem:[%s3121_s9 + $0x1] ss:$0 sm:$0xff] }
 0xcb7   : > { %v1720_v39 = vpop.f32.mrb[14].mxu0 }
 0xcb8   : > { %v1724_v40 = vmul.f32 0.25, %v1720_v39  ;;  %v2524_v41 = vpop.f32.mrb[15].mxu0  ;;  %v1559_v42 = vsel %vm738_vm3, %v1558_v38, -inf  ;;  %v2341_v39 = vld [vmem:[%s3124_s12 + $0x40] sm:$0xff] }
 0xcb9   : > { %1560 = vmax.xlane.f32.xlu1 %v1559_v42  ;;  %v2343_v42 = vld [vmem:[%s3124_s12 + $0x50] sm:$0xff] }
 0xcba   : > { %v1725_v43 = vadd.f32 %v2851_v31, %v1724_v40  ;;  %v2342_v40 = vld [vmem:[%s3124_s12 + $0x48] sm:$0xff] }
 0xcbb   : > { %v2623_v41 = vpack.c.bf16 %v2342_v40, %v2341_v39 }
 0xcbc   : > { %v1726_v44 = vsel %vm738_vm3, %v1725_v43, -inf }
 0xcbd   : > { %1727 = vmax.xlane.f32.xlu0 %v1726_v44 }
 0xd46   : > { %v1561_v45 = vpop.xlane.xlu1 %1560 }
 0xd47   : > { %v1562_v46 = vsub.f32 %v1558_v38, %v1561_v45  ;;  %v2345_v45 = vld [vmem:[%s3124_s12 + $0x60] sm:$0xff] }
 0xd49   : > { %v1563_v47 = vmul.f32 1.442695, %v1562_v46  ;;  %v2346_v46 = vld [vmem:[%s3124_s12 + $0x68] sm:$0xff] }
 0xd4a   : > { %v1728_v48 = vpop.xlane.xlu0 %1727 }
 0xd4b   : > { %2666 = vpow2.f32 %v1563_v47  ;;  %v1729_v49 = vsub.f32 %v1725_v43, %v1728_v48  ;;  %v2344_v43 = vld [vmem:[%s3124_s12 + $0x58] sm:$0xff]  ;;  %v2629_v47 = vpack.c.bf16 %v2346_v46, %v2345_v45  ;;  %v2347_v48 = vld [vmem:[%s3124_s12 + $0x70] sm:$0xff] }
 0xd4c   : > { %v2626_v44 = vpack.c.bf16 %v2344_v43, %v2343_v42 }
 0xd4d   : > { %v1730_v50 = vmul.f32 1.442695, %v1729_v49  ;;  %v2348_v49 = vld [vmem:[%s3124_s12 + $0x78] sm:$0xff] }
 0xd4f   : > { %2668 = vpow2.f32 %v1730_v50  ;;  %v2632_v50 = vpack.c.bf16 %v2348_v49, %v2347_v48 }
 0xd55   : > { %v2667_v51 = vpop.eup %2666 }
 0xd56   : > { %v1565_v52 = vsel %vm738_vm3, %v2667_v51, 0.0 }
 0xd57   : > { %1566 = vadd.xlane.f32.xlu0 %v1565_v52 }
 0xd59   : > { %v2669_v53 = vpop.eup %2668 }
 0xd5a   : > { %v1732_v54 = vsel %vm738_vm3, %v2669_v53, 0.0 }
 0xd5b   : > { %1733 = vadd.xlane.f32.xlu1 %v1732_v54 }
 0xd6c   : > { %1737 = vrot.lane.b32.xlu1 %v1472_v29, %s2694_s24 }
 0xd6d   : > { %1570 = vrot.lane.b32.xlu0 %v1472_v29, %s3133_s30 }
 0xde4   : > { %v1567_v31 = vpop.xlane.xlu0 %1566 }
 0xde5   : > { %2670 = vrcp.f32 %v1567_v31 }
 0xde8   : > { %v1734_v55 = vpop.xlane.xlu1 %1733  ;;  %v1571_v56 = vpop.permute.xlu0 %1570 }
 0xde9   : > { %2672 = vrcp.f32 %v1734_v55  ;;  %2516 = vmatpush3.msra.mxu1 %v1571_v56 }
 0xdea   : > { %2525 = vmatprep.subr.mxu1 %v2690_v13 }
 0xdec   : > { %v1738_v61 = vpop.permute.xlu1 %1737 }
 0xdef   : > { %v2671_v57 = vpop.eup %2670 }
 0xdf0   : > { %v1569_v58 = vmul.f32 %v2671_v57, %v2667_v51  ;;  %v2339_v51 = vld [vmem:[%s3123_s11 + $0x1] ss:$0 sm:$0xff] }
 0xdf2   : > { %2518 = vmatmul.mubr.msk.f32.vlgmr.msra.gmra.mrb[8].mxu1 %vm738_vm3, %v1569_v58 }
 0xdf3   : > { %v2673_v62 = vpop.eup %2672  ;;  %2526 = vmatpush3.msra.mxu1 %v1738_v61  ;;  %2527 = vmatprep.mubr.msk.f32.mxu1 %vm2689_vm1, %v2690_v13 }
 0xdf4   : > { %v1736_v0 = vmul.f32 %v2673_v62, %v2669_v53  ;;  %2613 = vmatprep.subr.bf16.mxu1 %v2688_v10 }
 0xdf6   : > { %2528 = vmatmul.mubr.msk.f32.vlgmr.msra.gmra.mrb[10].mxu1 %vm738_vm3, %v1736_v0 }
 0xdf7   : > { %2615 = vmatpush3.bf16.msra.mxu1 %v2614_v63  ;;  %2541 = vmatprep.mubr.msk.f32.mxu1 %vm2689_vm1, %v2690_v13 }
 0xdf8   : > { %2622 = vmatprep.subr.bf16.mxu1 %v2688_v10 }
 0xec5   : > { %v1642_v4 = vpop.f32.mrb[8].mxu1 }
 0xec6   : > { %v2519_v5 = vpop.f32.mrb[9].mxu1  ;;  %2542 = vmatmul.mubr.msk.f32.vlgmr.msra.gmra.mrb[12].mxu1 %vm655_vm2, %v1642_v4 }
 0xec7   : > { %2571 = vmatprep.mubr.msk.f32.mxu1 %vm2689_vm1, %v2690_v13  ;;  %2624 = vmatpush3.bf16.msra.mxu1 %v2623_v41 }
 0xec8   : > { %2625 = vmatprep.subr.bf16.mxu1 %v2688_v10 }
 0xec9   : > { %v1809_v6 = vpop.f32.mrb[10].mxu1 }
 0xeca   : > { %v2529_v7 = vpop.f32.mrb[11].mxu1  ;;  %2535 = vmatmul.mubr.msk.f32.vlgmr.msra.gmra.mrb[16].mxu0 %vm655_vm2, %v1809_v6 }
 0xecb   : > { %2552 = vmatprep.mubr.msk.f32.mxu0 %vm2689_vm1, %v2690_v13  ;;  %2618 = vmatpush3.bf16.msra.mxu0 %v2617_v23 }
 0xecc   : > { %2619 = vmatprep.subr.bf16.mxu0 %v2688_v10  ;;  %2627 = vmatpush3.bf16.msra.mxu1 %v2626_v44 }
 0xecd   : > { %2628 = vmatprep.subr.bf16.mxu1 %v2688_v10 }
 0xed0   : > { %2630 = vmatpush3.bf16.msra.mxu1 %v2629_v47 }
 0xed1   : > { %2631 = vmatprep.subr.bf16.mxu1 %v2688_v10  ;;  %v2350_v10 = vld [vmem:[%s3125_s13 + $0x1] ss:$0 sm:$0xff] }
 0xed4   : > { %2633 = vmatpush3.bf16.msra.mxu1 %v2632_v50 }
 0xf99   : > { %v1955_v8 = vpop.f32.mrb[12].mxu1 }
 0xf9a   : > { %v2543_v9 = vpop.f32.mrb[13].mxu1 }
 0xf9d   : > { %v1882_v11 = vpop.f32.mrb[16].mxu0 }
 0xf9e   : > { %v1956_v14 = vadd.f32 %v1955_v8, %v1882_v11  ;;  %v2536_v15 = vpop.f32.mrb[17].mxu0 }
 0xf9f   : > { %v2354_v15 = vld [vmem:[%s3126_s14 + $0x1] ss:$0 sm:$0xff] }
 0xfa0   : > { %v1967_v16 = vadd.f32 %v2329_v12, %v1956_v14 }
 0xfa2   : > { %v1968_v17 = vadd.f32 %v1967_v16, %v2977_v26  ;;  %v2336_v26 = vld [vmem:[%s3122_s10 + $0x30] sm:$0xff] }
 0xfa3   : > { %v2620_v28 = vpack.c.bf16 %v2337_v27, %v2336_v26 }
 0xfa4   : > { %v1973_v18 = vsel %vm535_vm0, %v1968_v17, 0.0 }
 0xfa5   : > { %1974 = vadd.xlane.f32.xlu1 %v1973_v18  ;;  %2621 = vmatpush3.bf16.msra.mxu0 %v2620_v28 }
0x1032   : > { %v1975_v19 = vpop.xlane.xlu1 %1974 }
0x1033   : > { %v1976_v20 = vmul.f32 0.03125, %v1975_v19 }
0x1035   : > { %v1977_v21 = vsub.f32 %v1968_v17, %v1976_v20  ;;  %v2355_v17 = vld [vmem:[%s3127_s15 + $0x1] ss:$0 sm:$0xff] }
0x1037   : > { %v1978_v22 = vmul.f32 %v1977_v21, %v1977_v21 }
0x1039   : > { %v1979_v13 = vsel %vm535_vm0, %v1978_v22, 0.0 }
0x103a   : > { %1980 = vadd.xlane.f32.xlu0 %v1979_v13 }
0x10c7   : > { %v1981_v29 = vpop.xlane.xlu0 %1980 }
0x10c8   : > { %v1982_v30 = vmul.f32 0.03125, %v1981_v29 }
0x10ca   : > { %v1983_v32 = vadd.f32 1e-12, %v1982_v30 }
0x10cc   : > { %2674 = vrsqrt.f32 %v1983_v32 }
0x10d6   : > { %v2675_v33 = vpop.eup %2674 }
0x10d7   : > { %v1985_v35 = vmul.f32 %v2675_v33, %v1977_v21 }
0x10d9   : > { %v1992_v37 = vmul.f32 %v2332_v34, %v1985_v35 }
0x10db   : > { %v1999_v38 = vadd.f32 %v2333_v36, %v1992_v37 }
0x10dd   : > { %2553 = vmatmul.mubr.msk.f32.vlgmr.msra.gmra.mrb[18].mxu0 %vm535_vm0, %v1999_v38 }
0x11b0   : > { %v2082_v52 = vpop.f32.mrb[18].mxu0 }
0x11b1   : > { %v2083_v53 = vadd.f32 %v2339_v51, %v2082_v52  ;;  %v2554_v54 = vpop.f32.mrb[19].mxu0 }
0x11b3   : > { %v2087_v31 = vmul.f32 0.044715, %v2083_v53  ;;  %v2086_v60 = vmul.f32 0.5, %v2083_v53 }
0x11b5   : > { %v2088_v55 = vmul.f32 %v2087_v31, %v2083_v53 }
0x11b7   : > { %v2089_v56 = vmul.f32 %v2088_v55, %v2083_v53 }
0x11b9   : > { %v2090_v57 = vadd.f32 %v2089_v56, %v2083_v53 }
0x11bb   : > { %v2091_v58 = vmul.f32 0.7978846, %v2090_v57 }
0x11bd   : > { %2676 = vtanh.f32 %v2091_v58 }
0x11c7   : > { %v2677_v59 = vpop.eup %2676 }
0x11c8   : > { %v2093_v61 = vadd.f32 1.0, %v2677_v59 }
0x11ca   : > { %v2094_v62 = vmul.f32 %v2093_v61, %v2086_v60 }
0x11cc   : > { %2572 = vmatmul.mubr.msk.f32.vlgmr.msra.gmra.mrb[14].mxu1 %vm1285_vm4, %v2094_v62 }
0x129f   : > { %v2181_v63 = vpop.f32.mrb[14].mxu1 }
0x12a0   : > { %v2182_v0 = vadd.f32 %v2350_v10, %v2181_v63  ;;  %v2573_v1 = vpop.f32.mrb[15].mxu1 }
0x12a2   : > { %v2185_v2 = vadd.f32 %v2182_v0, %v1999_v38 }
0x12a4   : > { %v2190_v3 = vsel %vm535_vm0, %v2185_v2, 0.0 }
0x12a5   : > { %2191 = vadd.xlane.f32.xlu0 %v2190_v3 }
0x1332   : > { %v2192_v4 = vpop.xlane.xlu0 %2191 }
0x1333   : > { %v2193_v5 = vmul.f32 0.03125, %v2192_v4 }
0x1335   : > { %v2194_v6 = vsub.f32 %v2185_v2, %v2193_v5 }
0x1337   : > { %v2195_v7 = vmul.f32 %v2194_v6, %v2194_v6 }
0x1339   : > { %v2196_v8 = vsel %vm535_vm0, %v2195_v7, 0.0 }
0x133a   : > { %2197 = vadd.xlane.f32.xlu1 %v2196_v8 }
0x13c7   : > { %v2198_v9 = vpop.xlane.xlu1 %2197 }
0x13c8   : > { %v2199_v11 = vmul.f32 0.03125, %v2198_v9 }
0x13ca   : > { %v2200_v12 = vadd.f32 1e-12, %v2199_v11 }
0x13cc   : > { %2678 = vrsqrt.f32 %v2200_v12 }
0x13d6   : > { %v2679_v14 = vpop.eup %2678 }
0x13d7   : > { %v2202_v16 = vmul.f32 %v2679_v14, %v2194_v6 }
0x13d9   : > { %v2209_v18 = vmul.f32 %v2354_v15, %v2202_v16 }
0x13db   : > { %v2216_v19 = vadd.f32 %v2355_v17, %v2209_v18 }
0x13dd   : > { %2217 = vst.msk [vmem:[%s530_s18] sm:$0xff] %vm535_vm0, %v2216_v19 }
0x13de PF: > { %s26_s21 = sadd.s32 1, %s2686_s21  }
0x13df   : > { %p23_p4 = scmp.ge.s32.totalorder %s26_s21, 4  }
0x13e1   :  { %25 = sbr.rel (!%p23_p4) target bundleno = 2 (0x2), region = 129 }

</bundles_post_ra>
